<compile_context>
chip_gen: v7x
topology: tpu7x:2x2x1
jax: 0.10.0
libtpu: 0.0.40
codegen_flags: <defaults>
</compile_context>

<pallas_src>
import jax
import jax.numpy as jnp
import numpy as np
from jax.experimental import pallas as pl

FEATURE_SIZE = 32
NHEADS = 4
HEAD_DIM = FEATURE_SIZE // NHEADS
NMOD = 3
PACKED = NMOD * FEATURE_SIZE            # 96 lanes
NH_TOTAL = NMOD * NHEADS                # 12 heads across all modalities
SCALE = 1.0 / float(np.sqrt(HEAD_DIM))
LN_EPS = 1e-5
NEG_BIG = -1e30


# ----------------------------------------------------------------------------
# Fused Pallas kernel: whole layer, all 3 modalities packed side-by-side.
# ----------------------------------------------------------------------------
def _mpcat_fused_kernel(x_ref, mask_ref, hmask_ref, mavg_ref,
                        wq_ref, bq_ref, wk_ref, bk_ref, wv_ref, bv_ref,
                        wo_ref, bo_ref, g1_ref, be1_ref,
                        w1_ref, b1_ref, w2_ref, b2_ref, g2_ref, be2_ref,
                        o_ref):
    B, S, P = x_ref.shape
    N = B * S
    x = x_ref[...].reshape(N, P)                      # packed [fa | fv | fl]

    # ---- packed Q/K/V projections (query-stream permutation + softmax scale
    #      folded into wq; wk/wv block-diagonal) ------------------------------
    q = jnp.dot(x, wq_ref[...], preferred_element_type=jnp.float32) + bq_ref[...]
    k = jnp.dot(x, wk_ref[...], preferred_element_type=jnp.float32) + bk_ref[...]
    v = jnp.dot(x, wv_ref[...], preferred_element_type=jnp.float32) + bv_ref[...]
    q3 = q.reshape(B, S, P)
    k3 = k.reshape(B, S, P)
    v3 = v.reshape(B, S, P)

    # Additive key-padding bias, built & broadcast ONCE (hoisted out of the
    # head loop); large finite negative -> exp underflows to exactly 0.
    bias = jnp.broadcast_to(
        (mask_ref[...] * jnp.float32(NEG_BIG))[:, None, :], (B, S, S))

    # Head-masked K/V stacks, hoisted: head h lives in lanes
    # h*HEAD_DIM:(h+1)*HEAD_DIM.  Masking K restricts the 96-wide score
    # contraction to that head; masking V restricts the output lanes.  No lane
    # slices, no concatenations.
    hmask = hmask_ref[...]                            # (NH_TOTAL, P) of {0,1}
    kh = k3[:, None, :, :] * hmask[None, :, None, :]  # (B, NH_TOTAL, S, P)
    vh = v3[:, None, :, :] * hmask[None, :, None, :]

    o_acc = jnp.zeros((B, S, P), jnp.float32)
    for h in range(NH_TOTAL):                          # static unroll, 12 heads
        s = jnp.einsum('bqd,bkd->bqk', q3, kh[:, h],
                       preferred_element_type=jnp.float32) + bias
        m = jnp.max(s, axis=-1, keepdims=True)
        e = jnp.exp(s - m)
        p = e * pl.reciprocal(jnp.sum(e, axis=-1, keepdims=True), approx=True)
        o_acc = o_acc + jnp.einsum('bqk,bkd->bqd', p, vh[:, h],
                                   preferred_element_type=jnp.float32)

    att = jnp.dot(o_acc.reshape(N, P), wo_ref[...],
                  preferred_element_type=jnp.float32) + bo_ref[...]

    # ---- segmented (per 32-lane modality block) LayerNorm via block-diagonal
    #      averaging matmul: lane-dense, no cross-lane reductions -------------
    mavg = mavg_ref[...]

    def seg_ln(val, g, b):
        mu = jnp.dot(val, mavg, preferred_element_type=jnp.float32)
        c = val - mu
        var = jnp.dot(c * c, mavg, preferred_element_type=jnp.float32)
        return c * jax.lax.rsqrt(var + LN_EPS) * g + b

    x1 = seg_ln(x + att, g1_ref[...], be1_ref[...])

    # ---- packed FFN: block-diag Linear(E,2E) -> ReLU -> Linear(2E,E) --------
    h1 = jnp.maximum(
        jnp.dot(x1, w1_ref[...], preferred_element_type=jnp.float32) + b1_ref[...],
        0.0)
    ff = jnp.dot(h1, w2_ref[...], preferred_element_type=jnp.float32) + b2_ref[...]

    x2 = seg_ln(x1 + ff, g2_ref[...], be2_ref[...])
    o_ref[...] = x2.reshape(B, S, P).astype(o_ref.dtype)


# ----------------------------------------------------------------------------
# Wrapper: one pallas_call, no grid (single step; everything resident in VMEM).
# ----------------------------------------------------------------------------
_WEIGHT_NAMES = ["hmask", "mavg", "wq", "bq", "wk", "bk", "wv", "bv", "wo", "bo",
                 "g1", "be1", "w1", "b1", "w2", "b2", "g2", "be2"]


def mpcat_forward_pallas(fa, fv, fl, key_padding_mask, fused):
    B, S, E = fa.shape
    x = jnp.concatenate([fa, fv, fl], axis=-1)            # (B, S, 3E) packed
    mask_f = key_padding_mask.astype(jnp.float32)          # 1.0 = ignore key
    out = pl.pallas_call(
        _mpcat_fused_kernel,
        out_shape=jax.ShapeDtypeStruct((B, S, NMOD * E), fa.dtype),
    )(x, mask_f, *[fused[n] for n in _WEIGHT_NAMES])
    return out[..., :E], out[..., E:2 * E], out[..., 2 * E:]


# ----------------------------------------------------------------------------
# One-time parameter prepack: block-diagonal weights, fused query permutation,
# folded softmax scale, head masks and segmented-LN averaging matrix.
# ----------------------------------------------------------------------------
def _block_diag(mats):
    r, c = mats[0].shape
    out = jnp.zeros((len(mats) * r, len(mats) * c), jnp.float32)
    for i, mat in enumerate(mats):
        out = out.at[i * r:(i + 1) * r, i * c:(i + 1) * c].set(mat)
    return out


def prepack_params(params):
    E, P = FEATURE_SIZE, PACKED
    mhas = [params["mha_a1"], params["mha_v1"], params["mha_l1"]]
    lns1 = [params["norm_a"], params["norm_v"], params["norm_l"]]
    fcs = [params["fc_a"], params["fc_v"], params["fc_l"]]
    lns2 = [params["norm_a1"], params["norm_v1"], params["norm_l1"]]

    # Packed blocks: 0=a, 1=v, 2=l.  Query source block per modality:
    # att_a uses q=fl (block 2), att_v uses q=fl (block 2), att_l uses q=fv (1).
    q_src = [2, 2, 1]
    wq = jnp.zeros((P, P), jnp.float32)
    for mod, (src, mha) in enumerate(zip(q_src, mhas)):
        wq = wq.at[src * E:(src + 1) * E, mod * E:(mod + 1) * E].set(
            mha["wq_t"] * SCALE)

    hmask = np.zeros((NH_TOTAL, P), np.float32)
    for h in range(NH_TOTAL):
        hmask[h, h * HEAD_DIM:(h + 1) * HEAD_DIM] = 1.0
    mavg = np.kron(np.eye(NMOD, dtype=np.float32),
                   np.full((E, E), 1.0 / E, dtype=np.float32))

    cat1 = lambda key, ps: jnp.concatenate([p[key] for p in ps], axis=1)
    return dict(
        hmask=jnp.asarray(hmask), mavg=jnp.asarray(mavg),
        wq=wq, bq=cat1("bq", mhas) * SCALE,
        wk=_block_diag([p["wk_t"] for p in mhas]), bk=cat1("bk", mhas),
        wv=_block_diag([p["wv_t"] for p in mhas]), bv=cat1("bv", mhas),
        wo=_block_diag([p["wo_t"] for p in mhas]), bo=cat1("bo", mhas),
        g1=cat1("gamma", lns1), be1=cat1("beta", lns1),
        w1=_block_diag([p["w1_t"] for p in fcs]), b1=cat1("b1", fcs),
        w2=_block_diag([p["w2_t"] for p in fcs]), b2=cat1("b2", fcs),
        g2=cat1("gamma", lns2), be2=cat1("beta", lns2),
    )


# ----------------------------------------------------------------------------
# Pure-JAX reference (faithful to the PyTorch forward; for correctness check)
# ----------------------------------------------------------------------------
def mha_ref(q, kv, p, mask_bool):
    B, S, E = q.shape
    Q = q @ p["wq_t"] + p["bq"]
    K = kv @ p["wk_t"] + p["bk"]
    V = kv @ p["wv_t"] + p["bv"]
    Qh = Q.reshape(B, S, NHEADS, HEAD_DIM).transpose(0, 2, 1, 3)
    Kh = K.reshape(B, S, NHEADS, HEAD_DIM).transpose(0, 2, 1, 3)
    Vh = V.reshape(B, S, NHEADS, HEAD_DIM).transpose(0, 2, 1, 3)
    s = jnp.einsum("bhqd,bhkd->bhqk", Qh, Kh) * SCALE
    s = s + jnp.where(mask_bool, -jnp.inf, 0.0)[:, None, None, :]
    a = jax.nn.softmax(s, axis=-1)
    o = jnp.einsum("bhqk,bhkd->bhqd", a, Vh).transpose(0, 2, 1, 3).reshape(B, S, E)
    return o @ p["wo_t"] + p["bo"]


def ln_ref(x, p):
    mean = jnp.mean(x, axis=-1, keepdims=True)
    var = jnp.mean((x - mean) ** 2, axis=-1, keepdims=True)
    return (x - mean) * jax.lax.rsqrt(var + LN_EPS) * p["gamma"] + p["beta"]


def ffn_ref(x, p):
    return jnp.maximum(x @ p["w1_t"] + p["b1"], 0.0) @ p["w2_t"] + p["b2"]


def mpcat_forward_ref(fa, fv, fl, mask_bool, params):
    att_a = mha_ref(fl, fa, params["mha_a1"], mask_bool)
    att_v = mha_ref(fl, fv, params["mha_v1"], mask_bool)
    att_l = mha_ref(fv, fl, params["mha_l1"], mask_bool)
    fa1 = ln_ref(fa + att_a, params["norm_a"])
    fv1 = ln_ref(fv + att_v, params["norm_v"])
    fl1 = ln_ref(fl + att_l, params["norm_l"])
    fa2 = ln_ref(fa1 + ffn_ref(fa1, params["fc_a"]), params["norm_a1"])
    fv2 = ln_ref(fv1 + ffn_ref(fv1, params["fc_v"]), params["norm_v1"])
    fl2 = ln_ref(fl1 + ffn_ref(fl1, params["fc_l"]), params["norm_l1"])
    return fa2, fv2, fl2


# ----------------------------------------------------------------------------
# Deterministic parameter init (shapes per MPCATLayer.__init__)
# ----------------------------------------------------------------------------
def init_mha_params(key, E):
    ks = jax.random.split(key, 4)
    in_proj_w = jax.random.normal(ks[0], (3 * E, E), jnp.float32) * 0.05
    in_proj_b = jax.random.normal(ks[1], (3 * E,), jnp.float32) * 0.05
    out_w = jax.random.normal(ks[2], (E, E), jnp.float32) * 0.05
    out_b = jax.random.normal(ks[3], (E,), jnp.float32) * 0.05
    return dict(
        wq_t=in_proj_w[0:E].T, wk_t=in_proj_w[E:2 * E].T, wv_t=in_proj_w[2 * E:3 * E].T,
        wo_t=out_w.T,
        bq=in_proj_b[0:E].reshape(1, E), bk=in_proj_b[E:2 * E].reshape(1, E),
        bv=in_proj_b[2 * E:3 * E].reshape(1, E), bo=out_b.reshape(1, E),
    )


def init_ln_params(key, E):
    k1, k2 = jax.random.split(key)
    return dict(gamma=1.0 + 0.05 * jax.random.normal(k1, (1, E), jnp.float32),
                beta=0.05 * jax.random.normal(k2, (1, E), jnp.float32))


def init_fc_params(key, E):
    ks = jax.random.split(key, 4)
    w1 = jax.random.normal(ks[0], (2 * E, E), jnp.float32) * 0.05   # fc:  Linear(E, 2E)
    b1 = jax.random.normal(ks[1], (2 * E,), jnp.float32) * 0.05
    w2 = jax.random.normal(ks[2], (E, 2 * E), jnp.float32) * 0.05   # fc1: Linear(2E, E)
    b2 = jax.random.normal(ks[3], (E,), jnp.float32) * 0.05
    return dict(w1_t=w1.T, b1=b1.reshape(1, 2 * E), w2_t=w2.T, b2=b2.reshape(1, E))


def init_params(key, E):
    names_mha = ["mha_a", "mha_a1", "mha_v", "mha_v1", "mha_l", "mha_l1"]
    names_ln = ["norm_a", "norm_a1", "norm_v", "norm_v1", "norm_l", "norm_l1"]
    names_fc = ["fc_a", "fc_v", "fc_l"]
    keys = jax.random.split(key, len(names_mha) + len(names_ln) + len(names_fc))
    params = {}
    i = 0
    for n in names_mha:
        params[n] = init_mha_params(keys[i], E); i += 1
    for n in names_ln:
        params[n] = init_ln_params(keys[i], E); i += 1
    for n in names_fc:
        params[n] = init_fc_params(keys[i], E); i += 1
    return params


# ----------------------------------------------------------------------------
if __name__ == "__main__":
    B, S, E = 2, 8, FEATURE_SIZE
    root = jax.random.PRNGKey(0)
    k_par, ka, kv_, kl = jax.random.split(root, 4)

    params = init_params(k_par, E)
    fused = prepack_params(params)       # one-time prepack (block-diag packing)

    features_a = jax.random.normal(ka, (B, S, E), jnp.float32)
    features_v = jax.random.normal(kv_, (B, S, E), jnp.float32)
    features_l = jax.random.normal(kl, (B, S, E), jnp.float32)
    # key_padding_mask: True = ignore this key position (as in PyTorch).
    key_padding_mask = jnp.zeros((B, S), dtype=bool).at[1, -2:].set(True)

    forward = jax.jit(mpcat_forward_pallas)
    out = forward(features_a, features_v, features_l, key_padding_mask, fused)
    out = jax.block_until_ready(out)

    ref = mpcat_forward_ref(features_a, features_v, features_l,
                            key_padding_mask, params)
    # Tolerance covers pl.reciprocal(approx=True) in the softmax and MXU f32
    # rounding in the packed / segmented-LN matmuls.
    for o, r in zip(out, ref):
        np.testing.assert_allclose(np.asarray(o), np.asarray(r), rtol=5e-3, atol=5e-3)

    print("KERNEL_OK")
</pallas_src>

<mosaic_0001>
module attributes {stable_mosaic.version = 11 : i64} {
  func.func @_mpcat_fused_kernel(%arg0: memref<2x8x96xf32, #tpu.memory_space<vmem>>, %arg1: memref<2x8xf32, #tpu.memory_space<vmem>>, %arg2: memref<12x96xf32, #tpu.memory_space<vmem>>, %arg3: memref<96x96xf32, #tpu.memory_space<vmem>>, %arg4: memref<96x96xf32, #tpu.memory_space<vmem>>, %arg5: memref<1x96xf32, #tpu.memory_space<vmem>>, %arg6: memref<96x96xf32, #tpu.memory_space<vmem>>, %arg7: memref<1x96xf32, #tpu.memory_space<vmem>>, %arg8: memref<96x96xf32, #tpu.memory_space<vmem>>, %arg9: memref<1x96xf32, #tpu.memory_space<vmem>>, %arg10: memref<96x96xf32, #tpu.memory_space<vmem>>, %arg11: memref<1x96xf32, #tpu.memory_space<vmem>>, %arg12: memref<1x96xf32, #tpu.memory_space<vmem>>, %arg13: memref<1x96xf32, #tpu.memory_space<vmem>>, %arg14: memref<96x192xf32, #tpu.memory_space<vmem>>, %arg15: memref<1x192xf32, #tpu.memory_space<vmem>>, %arg16: memref<192x96xf32, #tpu.memory_space<vmem>>, %arg17: memref<1x96xf32, #tpu.memory_space<vmem>>, %arg18: memref<1x96xf32, #tpu.memory_space<vmem>>, %arg19: memref<1x96xf32, #tpu.memory_space<vmem>>, %arg20: memref<2x8x96xf32, #tpu.memory_space<vmem>>) attributes {dimension_semantics = [], scalar_prefetch = 0 : i64, scratch_operands = 0 : i64, tpu.core_type = #tpu.core_type<tc>} {
    %c0 = arith.constant 0 : index
    %c0_0 = arith.constant 0 : index
    %c0_1 = arith.constant 0 : index
    %0 = vector.load %arg0[%c0, %c0_0, %c0_1] : memref<2x8x96xf32, #tpu.memory_space<vmem>>, vector<2x8x96xf32>
    %1 = vector.shape_cast %0 : vector<2x8x96xf32> to vector<16x96xf32>
    %c0_2 = arith.constant 0 : index
    %c0_3 = arith.constant 0 : index
    %2 = vector.load %arg4[%c0_2, %c0_3] : memref<96x96xf32, #tpu.memory_space<vmem>>, vector<96x96xf32>
    %cst = arith.constant dense<0.000000e+00> : vector<16x96xf32>
    %3 = tpu.matmul %1, %2, %cst {dimension_numbers = #tpu.dot_dimension_numbers<[1], [0], [0], [1], [0, 0, 1, 1], [], []>} : vector<16x96xf32>, vector<96x96xf32>, vector<16x96xf32> -> vector<16x96xf32>
    %c0_4 = arith.constant 0 : index
    %c0_5 = arith.constant 0 : index
    %4 = vector.load %arg5[%c0_4, %c0_5] : memref<1x96xf32, #tpu.memory_space<vmem>>, vector<1x96xf32>
    %5 = vector.broadcast %4 : vector<1x96xf32> to vector<16x96xf32>
    %6 = arith.addf %3, %5 : vector<16x96xf32>
    %c0_6 = arith.constant 0 : index
    %c0_7 = arith.constant 0 : index
    %7 = vector.load %arg6[%c0_6, %c0_7] : memref<96x96xf32, #tpu.memory_space<vmem>>, vector<96x96xf32>
    %cst_8 = arith.constant dense<0.000000e+00> : vector<16x96xf32>
    %8 = tpu.matmul %1, %7, %cst_8 {dimension_numbers = #tpu.dot_dimension_numbers<[1], [0], [0], [1], [0, 0, 1, 1], [], []>} : vector<16x96xf32>, vector<96x96xf32>, vector<16x96xf32> -> vector<16x96xf32>
    %c0_9 = arith.constant 0 : index
    %c0_10 = arith.constant 0 : index
    %9 = vector.load %arg7[%c0_9, %c0_10] : memref<1x96xf32, #tpu.memory_space<vmem>>, vector<1x96xf32>
    %10 = vector.broadcast %9 : vector<1x96xf32> to vector<16x96xf32>
    %11 = arith.addf %8, %10 : vector<16x96xf32>
    %c0_11 = arith.constant 0 : index
    %c0_12 = arith.constant 0 : index
    %12 = vector.load %arg8[%c0_11, %c0_12] : memref<96x96xf32, #tpu.memory_space<vmem>>, vector<96x96xf32>
    %cst_13 = arith.constant dense<0.000000e+00> : vector<16x96xf32>
    %13 = tpu.matmul %1, %12, %cst_13 {dimension_numbers = #tpu.dot_dimension_numbers<[1], [0], [0], [1], [0, 0, 1, 1], [], []>} : vector<16x96xf32>, vector<96x96xf32>, vector<16x96xf32> -> vector<16x96xf32>
    %c0_14 = arith.constant 0 : index
    %c0_15 = arith.constant 0 : index
    %14 = vector.load %arg9[%c0_14, %c0_15] : memref<1x96xf32, #tpu.memory_space<vmem>>, vector<1x96xf32>
    %15 = vector.broadcast %14 : vector<1x96xf32> to vector<16x96xf32>
    %16 = arith.addf %13, %15 : vector<16x96xf32>
    %17 = vector.shape_cast %6 : vector<16x96xf32> to vector<2x8x96xf32>
    %18 = vector.shape_cast %11 : vector<16x96xf32> to vector<2x8x96xf32>
    %19 = vector.shape_cast %16 : vector<16x96xf32> to vector<2x8x96xf32>
    %c0_16 = arith.constant 0 : index
    %c0_17 = arith.constant 0 : index
    %20 = vector.load %arg1[%c0_16, %c0_17] : memref<2x8xf32, #tpu.memory_space<vmem>>, vector<2x8xf32>
    %cst_18 = arith.constant -1.000000e+30 : f32
    %21 = vector.broadcast %cst_18 : f32 to vector<2x8xf32>
    %22 = arith.mulf %20, %21 : vector<2x8xf32>
    %23 = vector.shape_cast %22 : vector<2x8xf32> to vector<2x1x8xf32>
    %24 = vector.shape_cast %23 : vector<2x1x8xf32> to vector<2x1x8xf32>
    %25 = vector.broadcast %24 : vector<2x1x8xf32> to vector<2x8x8xf32>
    %c0_19 = arith.constant 0 : index
    %c0_20 = arith.constant 0 : index
    %26 = vector.load %arg2[%c0_19, %c0_20] : memref<12x96xf32, #tpu.memory_space<vmem>>, vector<12x96xf32>
    %27 = vector.shape_cast %18 : vector<2x8x96xf32> to vector<2x1x8x96xf32>
    %28 = vector.shape_cast %26 : vector<12x96xf32> to vector<1x12x1x96xf32>
    %29 = vector.broadcast %27 : vector<2x1x8x96xf32> to vector<2x12x8x96xf32>
    %30 = vector.broadcast %28 : vector<1x12x1x96xf32> to vector<2x12x8x96xf32>
    %31 = arith.mulf %29, %30 : vector<2x12x8x96xf32>
    %32 = vector.shape_cast %19 : vector<2x8x96xf32> to vector<2x1x8x96xf32>
    %33 = vector.shape_cast %26 : vector<12x96xf32> to vector<1x12x1x96xf32>
    %34 = vector.broadcast %32 : vector<2x1x8x96xf32> to vector<2x12x8x96xf32>
    %35 = vector.broadcast %33 : vector<1x12x1x96xf32> to vector<2x12x8x96xf32>
    %36 = arith.mulf %34, %35 : vector<2x12x8x96xf32>
    %cst_21 = arith.constant 0.000000e+00 : f32
    %37 = vector.broadcast %cst_21 : f32 to vector<2x8x96xf32>
    %38 = vector.extract_strided_slice %31 {offsets = [0, 0, 0, 0], sizes = [2, 1, 8, 96], strides = [1, 1, 1, 1]} : vector<2x12x8x96xf32> to vector<2x1x8x96xf32>
    %39 = vector.shape_cast %38 : vector<2x1x8x96xf32> to vector<2x8x96xf32>
    "tpu.trace_start"() <{level = 10 : i32, message = "bqd,bkd->bqk"}> : () -> ()
    %cst_22 = arith.constant dense<0.000000e+00> : vector<2x8x8xf32>
    %40 = tpu.matmul %17, %39, %cst_22 {dimension_numbers = #tpu.dot_dimension_numbers<[2], [2], [1], [1], [0, 0, 0, 1, 1, 1], [0], [0]>} : vector<2x8x96xf32>, vector<2x8x96xf32>, vector<2x8x8xf32> -> vector<2x8x8xf32>
    "tpu.trace_stop"() : () -> ()
    %41 = arith.addf %40, %25 : vector<2x8x8xf32>
    %cst_23 = arith.constant dense<0xFF800000> : vector<2x8xf32>
    %42 = vector.multi_reduction <maximumf>, %41, %cst_23 [2] : vector<2x8x8xf32> to vector<2x8xf32>
    %43 = vector.shape_cast %42 : vector<2x8xf32> to vector<2x8x1xf32>
    %44 = vector.broadcast %43 : vector<2x8x1xf32> to vector<2x8x8xf32>
    %45 = arith.subf %41, %44 : vector<2x8x8xf32>
    %46 = math.exp %45 : vector<2x8x8xf32>
    %cst_24 = arith.constant dense<0.000000e+00> : vector<2x8xf32>
    %47 = vector.multi_reduction <add>, %46, %cst_24 [2] : vector<2x8x8xf32> to vector<2x8xf32>
    %48 = vector.shape_cast %47 : vector<2x8xf32> to vector<2x8x1xf32>
    %49 = tpu.reciprocal %48 {approx = true} : vector<2x8x1xf32> -> vector<2x8x1xf32>
    %50 = vector.broadcast %49 : vector<2x8x1xf32> to vector<2x8x8xf32>
    %51 = arith.mulf %46, %50 : vector<2x8x8xf32>
    %52 = vector.extract_strided_slice %36 {offsets = [0, 0, 0, 0], sizes = [2, 1, 8, 96], strides = [1, 1, 1, 1]} : vector<2x12x8x96xf32> to vector<2x1x8x96xf32>
    %53 = vector.shape_cast %52 : vector<2x1x8x96xf32> to vector<2x8x96xf32>
    "tpu.trace_start"() <{level = 10 : i32, message = "bqk,bkd->bqd"}> : () -> ()
    %cst_25 = arith.constant dense<0.000000e+00> : vector<2x8x96xf32>
    %54 = tpu.matmul %51, %53, %cst_25 {dimension_numbers = #tpu.dot_dimension_numbers<[2], [1], [1], [2], [0, 0, 0, 1, 1, 2], [0], [0]>} : vector<2x8x8xf32>, vector<2x8x96xf32>, vector<2x8x96xf32> -> vector<2x8x96xf32>
    "tpu.trace_stop"() : () -> ()
    %55 = arith.addf %37, %54 : vector<2x8x96xf32>
    %56 = vector.extract_strided_slice %31 {offsets = [0, 1, 0, 0], sizes = [2, 1, 8, 96], strides = [1, 1, 1, 1]} : vector<2x12x8x96xf32> to vector<2x1x8x96xf32>
    %57 = vector.shape_cast %56 : vector<2x1x8x96xf32> to vector<2x8x96xf32>
    "tpu.trace_start"() <{level = 10 : i32, message = "bqd,bkd->bqk"}> : () -> ()
    %cst_26 = arith.constant dense<0.000000e+00> : vector<2x8x8xf32>
    %58 = tpu.matmul %17, %57, %cst_26 {dimension_numbers = #tpu.dot_dimension_numbers<[2], [2], [1], [1], [0, 0, 0, 1, 1, 1], [0], [0]>} : vector<2x8x96xf32>, vector<2x8x96xf32>, vector<2x8x8xf32> -> vector<2x8x8xf32>
    "tpu.trace_stop"() : () -> ()
    %59 = arith.addf %58, %25 : vector<2x8x8xf32>
    %cst_27 = arith.constant dense<0xFF800000> : vector<2x8xf32>
    %60 = vector.multi_reduction <maximumf>, %59, %cst_27 [2] : vector<2x8x8xf32> to vector<2x8xf32>
    %61 = vector.shape_cast %60 : vector<2x8xf32> to vector<2x8x1xf32>
    %62 = vector.broadcast %61 : vector<2x8x1xf32> to vector<2x8x8xf32>
    %63 = arith.subf %59, %62 : vector<2x8x8xf32>
    %64 = math.exp %63 : vector<2x8x8xf32>
    %cst_28 = arith.constant dense<0.000000e+00> : vector<2x8xf32>
    %65 = vector.multi_reduction <add>, %64, %cst_28 [2] : vector<2x8x8xf32> to vector<2x8xf32>
    %66 = vector.shape_cast %65 : vector<2x8xf32> to vector<2x8x1xf32>
    %67 = tpu.reciprocal %66 {approx = true} : vector<2x8x1xf32> -> vector<2x8x1xf32>
    %68 = vector.broadcast %67 : vector<2x8x1xf32> to vector<2x8x8xf32>
    %69 = arith.mulf %64, %68 : vector<2x8x8xf32>
    %70 = vector.extract_strided_slice %36 {offsets = [0, 1, 0, 0], sizes = [2, 1, 8, 96], strides = [1, 1, 1, 1]} : vector<2x12x8x96xf32> to vector<2x1x8x96xf32>
    %71 = vector.shape_cast %70 : vector<2x1x8x96xf32> to vector<2x8x96xf32>
    "tpu.trace_start"() <{level = 10 : i32, message = "bqk,bkd->bqd"}> : () -> ()
    %cst_29 = arith.constant dense<0.000000e+00> : vector<2x8x96xf32>
    %72 = tpu.matmul %69, %71, %cst_29 {dimension_numbers = #tpu.dot_dimension_numbers<[2], [1], [1], [2], [0, 0, 0, 1, 1, 2], [0], [0]>} : vector<2x8x8xf32>, vector<2x8x96xf32>, vector<2x8x96xf32> -> vector<2x8x96xf32>
    "tpu.trace_stop"() : () -> ()
    %73 = arith.addf %55, %72 : vector<2x8x96xf32>
    %74 = vector.extract_strided_slice %31 {offsets = [0, 2, 0, 0], sizes = [2, 1, 8, 96], strides = [1, 1, 1, 1]} : vector<2x12x8x96xf32> to vector<2x1x8x96xf32>
    %75 = vector.shape_cast %74 : vector<2x1x8x96xf32> to vector<2x8x96xf32>
    "tpu.trace_start"() <{level = 10 : i32, message = "bqd,bkd->bqk"}> : () -> ()
    %cst_30 = arith.constant dense<0.000000e+00> : vector<2x8x8xf32>
    %76 = tpu.matmul %17, %75, %cst_30 {dimension_numbers = #tpu.dot_dimension_numbers<[2], [2], [1], [1], [0, 0, 0, 1, 1, 1], [0], [0]>} : vector<2x8x96xf32>, vector<2x8x96xf32>, vector<2x8x8xf32> -> vector<2x8x8xf32>
    "tpu.trace_stop"() : () -> ()
    %77 = arith.addf %76, %25 : vector<2x8x8xf32>
    %cst_31 = arith.constant dense<0xFF800000> : vector<2x8xf32>
    %78 = vector.multi_reduction <maximumf>, %77, %cst_31 [2] : vector<2x8x8xf32> to vector<2x8xf32>
    %79 = vector.shape_cast %78 : vector<2x8xf32> to vector<2x8x1xf32>
    %80 = vector.broadcast %79 : vector<2x8x1xf32> to vector<2x8x8xf32>
    %81 = arith.subf %77, %80 : vector<2x8x8xf32>
    %82 = math.exp %81 : vector<2x8x8xf32>
    %cst_32 = arith.constant dense<0.000000e+00> : vector<2x8xf32>
    %83 = vector.multi_reduction <add>, %82, %cst_32 [2] : vector<2x8x8xf32> to vector<2x8xf32>
    %84 = vector.shape_cast %83 : vector<2x8xf32> to vector<2x8x1xf32>
    %85 = tpu.reciprocal %84 {approx = true} : vector<2x8x1xf32> -> vector<2x8x1xf32>
    %86 = vector.broadcast %85 : vector<2x8x1xf32> to vector<2x8x8xf32>
    %87 = arith.mulf %82, %86 : vector<2x8x8xf32>
    %88 = vector.extract_strided_slice %36 {offsets = [0, 2, 0, 0], sizes = [2, 1, 8, 96], strides = [1, 1, 1, 1]} : vector<2x12x8x96xf32> to vector<2x1x8x96xf32>
    %89 = vector.shape_cast %88 : vector<2x1x8x96xf32> to vector<2x8x96xf32>
    "tpu.trace_start"() <{level = 10 : i32, message = "bqk,bkd->bqd"}> : () -> ()
    %cst_33 = arith.constant dense<0.000000e+00> : vector<2x8x96xf32>
    %90 = tpu.matmul %87, %89, %cst_33 {dimension_numbers = #tpu.dot_dimension_numbers<[2], [1], [1], [2], [0, 0, 0, 1, 1, 2], [0], [0]>} : vector<2x8x8xf32>, vector<2x8x96xf32>, vector<2x8x96xf32> -> vector<2x8x96xf32>
    "tpu.trace_stop"() : () -> ()
    %91 = arith.addf %73, %90 : vector<2x8x96xf32>
    %92 = vector.extract_strided_slice %31 {offsets = [0, 3, 0, 0], sizes = [2, 1, 8, 96], strides = [1, 1, 1, 1]} : vector<2x12x8x96xf32> to vector<2x1x8x96xf32>
    %93 = vector.shape_cast %92 : vector<2x1x8x96xf32> to vector<2x8x96xf32>
    "tpu.trace_start"() <{level = 10 : i32, message = "bqd,bkd->bqk"}> : () -> ()
    %cst_34 = arith.constant dense<0.000000e+00> : vector<2x8x8xf32>
    %94 = tpu.matmul %17, %93, %cst_34 {dimension_numbers = #tpu.dot_dimension_numbers<[2], [2], [1], [1], [0, 0, 0, 1, 1, 1], [0], [0]>} : vector<2x8x96xf32>, vector<2x8x96xf32>, vector<2x8x8xf32> -> vector<2x8x8xf32>
    "tpu.trace_stop"() : () -> ()
    %95 = arith.addf %94, %25 : vector<2x8x8xf32>
    %cst_35 = arith.constant dense<0xFF800000> : vector<2x8xf32>
    %96 = vector.multi_reduction <maximumf>, %95, %cst_35 [2] : vector<2x8x8xf32> to vector<2x8xf32>
    %97 = vector.shape_cast %96 : vector<2x8xf32> to vector<2x8x1xf32>
    %98 = vector.broadcast %97 : vector<2x8x1xf32> to vector<2x8x8xf32>
    %99 = arith.subf %95, %98 : vector<2x8x8xf32>
    %100 = math.exp %99 : vector<2x8x8xf32>
    %cst_36 = arith.constant dense<0.000000e+00> : vector<2x8xf32>
    %101 = vector.multi_reduction <add>, %100, %cst_36 [2] : vector<2x8x8xf32> to vector<2x8xf32>
    %102 = vector.shape_cast %101 : vector<2x8xf32> to vector<2x8x1xf32>
    %103 = tpu.reciprocal %102 {approx = true} : vector<2x8x1xf32> -> vector<2x8x1xf32>
    %104 = vector.broadcast %103 : vector<2x8x1xf32> to vector<2x8x8xf32>
    %105 = arith.mulf %100, %104 : vector<2x8x8xf32>
    %106 = vector.extract_strided_slice %36 {offsets = [0, 3, 0, 0], sizes = [2, 1, 8, 96], strides = [1, 1, 1, 1]} : vector<2x12x8x96xf32> to vector<2x1x8x96xf32>
    %107 = vector.shape_cast %106 : vector<2x1x8x96xf32> to vector<2x8x96xf32>
    "tpu.trace_start"() <{level = 10 : i32, message = "bqk,bkd->bqd"}> : () -> ()
    %cst_37 = arith.constant dense<0.000000e+00> : vector<2x8x96xf32>
    %108 = tpu.matmul %105, %107, %cst_37 {dimension_numbers = #tpu.dot_dimension_numbers<[2], [1], [1], [2], [0, 0, 0, 1, 1, 2], [0], [0]>} : vector<2x8x8xf32>, vector<2x8x96xf32>, vector<2x8x96xf32> -> vector<2x8x96xf32>
    "tpu.trace_stop"() : () -> ()
    %109 = arith.addf %91, %108 : vector<2x8x96xf32>
    %110 = vector.extract_strided_slice %31 {offsets = [0, 4, 0, 0], sizes = [2, 1, 8, 96], strides = [1, 1, 1, 1]} : vector<2x12x8x96xf32> to vector<2x1x8x96xf32>
    %111 = vector.shape_cast %110 : vector<2x1x8x96xf32> to vector<2x8x96xf32>
    "tpu.trace_start"() <{level = 10 : i32, message = "bqd,bkd->bqk"}> : () -> ()
    %cst_38 = arith.constant dense<0.000000e+00> : vector<2x8x8xf32>
    %112 = tpu.matmul %17, %111, %cst_38 {dimension_numbers = #tpu.dot_dimension_numbers<[2], [2], [1], [1], [0, 0, 0, 1, 1, 1], [0], [0]>} : vector<2x8x96xf32>, vector<2x8x96xf32>, vector<2x8x8xf32> -> vector<2x8x8xf32>
    "tpu.trace_stop"() : () -> ()
    %113 = arith.addf %112, %25 : vector<2x8x8xf32>
    %cst_39 = arith.constant dense<0xFF800000> : vector<2x8xf32>
    %114 = vector.multi_reduction <maximumf>, %113, %cst_39 [2] : vector<2x8x8xf32> to vector<2x8xf32>
    %115 = vector.shape_cast %114 : vector<2x8xf32> to vector<2x8x1xf32>
    %116 = vector.broadcast %115 : vector<2x8x1xf32> to vector<2x8x8xf32>
    %117 = arith.subf %113, %116 : vector<2x8x8xf32>
    %118 = math.exp %117 : vector<2x8x8xf32>
    %cst_40 = arith.constant dense<0.000000e+00> : vector<2x8xf32>
    %119 = vector.multi_reduction <add>, %118, %cst_40 [2] : vector<2x8x8xf32> to vector<2x8xf32>
    %120 = vector.shape_cast %119 : vector<2x8xf32> to vector<2x8x1xf32>
    %121 = tpu.reciprocal %120 {approx = true} : vector<2x8x1xf32> -> vector<2x8x1xf32>
    %122 = vector.broadcast %121 : vector<2x8x1xf32> to vector<2x8x8xf32>
    %123 = arith.mulf %118, %122 : vector<2x8x8xf32>
    %124 = vector.extract_strided_slice %36 {offsets = [0, 4, 0, 0], sizes = [2, 1, 8, 96], strides = [1, 1, 1, 1]} : vector<2x12x8x96xf32> to vector<2x1x8x96xf32>
    %125 = vector.shape_cast %124 : vector<2x1x8x96xf32> to vector<2x8x96xf32>
    "tpu.trace_start"() <{level = 10 : i32, message = "bqk,bkd->bqd"}> : () -> ()
    %cst_41 = arith.constant dense<0.000000e+00> : vector<2x8x96xf32>
    %126 = tpu.matmul %123, %125, %cst_41 {dimension_numbers = #tpu.dot_dimension_numbers<[2], [1], [1], [2], [0, 0, 0, 1, 1, 2], [0], [0]>} : vector<2x8x8xf32>, vector<2x8x96xf32>, vector<2x8x96xf32> -> vector<2x8x96xf32>
    "tpu.trace_stop"() : () -> ()
    %127 = arith.addf %109, %126 : vector<2x8x96xf32>
    %128 = vector.extract_strided_slice %31 {offsets = [0, 5, 0, 0], sizes = [2, 1, 8, 96], strides = [1, 1, 1, 1]} : vector<2x12x8x96xf32> to vector<2x1x8x96xf32>
    %129 = vector.shape_cast %128 : vector<2x1x8x96xf32> to vector<2x8x96xf32>
    "tpu.trace_start"() <{level = 10 : i32, message = "bqd,bkd->bqk"}> : () -> ()
    %cst_42 = arith.constant dense<0.000000e+00> : vector<2x8x8xf32>
    %130 = tpu.matmul %17, %129, %cst_42 {dimension_numbers = #tpu.dot_dimension_numbers<[2], [2], [1], [1], [0, 0, 0, 1, 1, 1], [0], [0]>} : vector<2x8x96xf32>, vector<2x8x96xf32>, vector<2x8x8xf32> -> vector<2x8x8xf32>
    "tpu.trace_stop"() : () -> ()
    %131 = arith.addf %130, %25 : vector<2x8x8xf32>
    %cst_43 = arith.constant dense<0xFF800000> : vector<2x8xf32>
    %132 = vector.multi_reduction <maximumf>, %131, %cst_43 [2] : vector<2x8x8xf32> to vector<2x8xf32>
    %133 = vector.shape_cast %132 : vector<2x8xf32> to vector<2x8x1xf32>
    %134 = vector.broadcast %133 : vector<2x8x1xf32> to vector<2x8x8xf32>
    %135 = arith.subf %131, %134 : vector<2x8x8xf32>
    %136 = math.exp %135 : vector<2x8x8xf32>
    %cst_44 = arith.constant dense<0.000000e+00> : vector<2x8xf32>
    %137 = vector.multi_reduction <add>, %136, %cst_44 [2] : vector<2x8x8xf32> to vector<2x8xf32>
    %138 = vector.shape_cast %137 : vector<2x8xf32> to vector<2x8x1xf32>
    %139 = tpu.reciprocal %138 {approx = true} : vector<2x8x1xf32> -> vector<2x8x1xf32>
    %140 = vector.broadcast %139 : vector<2x8x1xf32> to vector<2x8x8xf32>
    %141 = arith.mulf %136, %140 : vector<2x8x8xf32>
    %142 = vector.extract_strided_slice %36 {offsets = [0, 5, 0, 0], sizes = [2, 1, 8, 96], strides = [1, 1, 1, 1]} : vector<2x12x8x96xf32> to vector<2x1x8x96xf32>
    %143 = vector.shape_cast %142 : vector<2x1x8x96xf32> to vector<2x8x96xf32>
    "tpu.trace_start"() <{level = 10 : i32, message = "bqk,bkd->bqd"}> : () -> ()
    %cst_45 = arith.constant dense<0.000000e+00> : vector<2x8x96xf32>
    %144 = tpu.matmul %141, %143, %cst_45 {dimension_numbers = #tpu.dot_dimension_numbers<[2], [1], [1], [2], [0, 0, 0, 1, 1, 2], [0], [0]>} : vector<2x8x8xf32>, vector<2x8x96xf32>, vector<2x8x96xf32> -> vector<2x8x96xf32>
    "tpu.trace_stop"() : () -> ()
    %145 = arith.addf %127, %144 : vector<2x8x96xf32>
    %146 = vector.extract_strided_slice %31 {offsets = [0, 6, 0, 0], sizes = [2, 1, 8, 96], strides = [1, 1, 1, 1]} : vector<2x12x8x96xf32> to vector<2x1x8x96xf32>
    %147 = vector.shape_cast %146 : vector<2x1x8x96xf32> to vector<2x8x96xf32>
    "tpu.trace_start"() <{level = 10 : i32, message = "bqd,bkd->bqk"}> : () -> ()
    %cst_46 = arith.constant dense<0.000000e+00> : vector<2x8x8xf32>
    %148 = tpu.matmul %17, %147, %cst_46 {dimension_numbers = #tpu.dot_dimension_numbers<[2], [2], [1], [1], [0, 0, 0, 1, 1, 1], [0], [0]>} : vector<2x8x96xf32>, vector<2x8x96xf32>, vector<2x8x8xf32> -> vector<2x8x8xf32>
    "tpu.trace_stop"() : () -> ()
    %149 = arith.addf %148, %25 : vector<2x8x8xf32>
    %cst_47 = arith.constant dense<0xFF800000> : vector<2x8xf32>
    %150 = vector.multi_reduction <maximumf>, %149, %cst_47 [2] : vector<2x8x8xf32> to vector<2x8xf32>
    %151 = vector.shape_cast %150 : vector<2x8xf32> to vector<2x8x1xf32>
    %152 = vector.broadcast %151 : vector<2x8x1xf32> to vector<2x8x8xf32>
    %153 = arith.subf %149, %152 : vector<2x8x8xf32>
    %154 = math.exp %153 : vector<2x8x8xf32>
    %cst_48 = arith.constant dense<0.000000e+00> : vector<2x8xf32>
    %155 = vector.multi_reduction <add>, %154, %cst_48 [2] : vector<2x8x8xf32> to vector<2x8xf32>
    %156 = vector.shape_cast %155 : vector<2x8xf32> to vector<2x8x1xf32>
    %157 = tpu.reciprocal %156 {approx = true} : vector<2x8x1xf32> -> vector<2x8x1xf32>
    %158 = vector.broadcast %157 : vector<2x8x1xf32> to vector<2x8x8xf32>
    %159 = arith.mulf %154, %158 : vector<2x8x8xf32>
    %160 = vector.extract_strided_slice %36 {offsets = [0, 6, 0, 0], sizes = [2, 1, 8, 96], strides = [1, 1, 1, 1]} : vector<2x12x8x96xf32> to vector<2x1x8x96xf32>
    %161 = vector.shape_cast %160 : vector<2x1x8x96xf32> to vector<2x8x96xf32>
    "tpu.trace_start"() <{level = 10 : i32, message = "bqk,bkd->bqd"}> : () -> ()
    %cst_49 = arith.constant dense<0.000000e+00> : vector<2x8x96xf32>
    %162 = tpu.matmul %159, %161, %cst_49 {dimension_numbers = #tpu.dot_dimension_numbers<[2], [1], [1], [2], [0, 0, 0, 1, 1, 2], [0], [0]>} : vector<2x8x8xf32>, vector<2x8x96xf32>, vector<2x8x96xf32> -> vector<2x8x96xf32>
    "tpu.trace_stop"() : () -> ()
    %163 = arith.addf %145, %162 : vector<2x8x96xf32>
    %164 = vector.extract_strided_slice %31 {offsets = [0, 7, 0, 0], sizes = [2, 1, 8, 96], strides = [1, 1, 1, 1]} : vector<2x12x8x96xf32> to vector<2x1x8x96xf32>
    %165 = vector.shape_cast %164 : vector<2x1x8x96xf32> to vector<2x8x96xf32>
    "tpu.trace_start"() <{level = 10 : i32, message = "bqd,bkd->bqk"}> : () -> ()
    %cst_50 = arith.constant dense<0.000000e+00> : vector<2x8x8xf32>
    %166 = tpu.matmul %17, %165, %cst_50 {dimension_numbers = #tpu.dot_dimension_numbers<[2], [2], [1], [1], [0, 0, 0, 1, 1, 1], [0], [0]>} : vector<2x8x96xf32>, vector<2x8x96xf32>, vector<2x8x8xf32> -> vector<2x8x8xf32>
    "tpu.trace_stop"() : () -> ()
    %167 = arith.addf %166, %25 : vector<2x8x8xf32>
    %cst_51 = arith.constant dense<0xFF800000> : vector<2x8xf32>
    %168 = vector.multi_reduction <maximumf>, %167, %cst_51 [2] : vector<2x8x8xf32> to vector<2x8xf32>
    %169 = vector.shape_cast %168 : vector<2x8xf32> to vector<2x8x1xf32>
    %170 = vector.broadcast %169 : vector<2x8x1xf32> to vector<2x8x8xf32>
    %171 = arith.subf %167, %170 : vector<2x8x8xf32>
    %172 = math.exp %171 : vector<2x8x8xf32>
    %cst_52 = arith.constant dense<0.000000e+00> : vector<2x8xf32>
    %173 = vector.multi_reduction <add>, %172, %cst_52 [2] : vector<2x8x8xf32> to vector<2x8xf32>
    %174 = vector.shape_cast %173 : vector<2x8xf32> to vector<2x8x1xf32>
    %175 = tpu.reciprocal %174 {approx = true} : vector<2x8x1xf32> -> vector<2x8x1xf32>
    %176 = vector.broadcast %175 : vector<2x8x1xf32> to vector<2x8x8xf32>
    %177 = arith.mulf %172, %176 : vector<2x8x8xf32>
    %178 = vector.extract_strided_slice %36 {offsets = [0, 7, 0, 0], sizes = [2, 1, 8, 96], strides = [1, 1, 1, 1]} : vector<2x12x8x96xf32> to vector<2x1x8x96xf32>
    %179 = vector.shape_cast %178 : vector<2x1x8x96xf32> to vector<2x8x96xf32>
    "tpu.trace_start"() <{level = 10 : i32, message = "bqk,bkd->bqd"}> : () -> ()
    %cst_53 = arith.constant dense<0.000000e+00> : vector<2x8x96xf32>
    %180 = tpu.matmul %177, %179, %cst_53 {dimension_numbers = #tpu.dot_dimension_numbers<[2], [1], [1], [2], [0, 0, 0, 1, 1, 2], [0], [0]>} : vector<2x8x8xf32>, vector<2x8x96xf32>, vector<2x8x96xf32> -> vector<2x8x96xf32>
    "tpu.trace_stop"() : () -> ()
    %181 = arith.addf %163, %180 : vector<2x8x96xf32>
    %182 = vector.extract_strided_slice %31 {offsets = [0, 8, 0, 0], sizes = [2, 1, 8, 96], strides = [1, 1, 1, 1]} : vector<2x12x8x96xf32> to vector<2x1x8x96xf32>
    %183 = vector.shape_cast %182 : vector<2x1x8x96xf32> to vector<2x8x96xf32>
    "tpu.trace_start"() <{level = 10 : i32, message = "bqd,bkd->bqk"}> : () -> ()
    %cst_54 = arith.constant dense<0.000000e+00> : vector<2x8x8xf32>
    %184 = tpu.matmul %17, %183, %cst_54 {dimension_numbers = #tpu.dot_dimension_numbers<[2], [2], [1], [1], [0, 0, 0, 1, 1, 1], [0], [0]>} : vector<2x8x96xf32>, vector<2x8x96xf32>, vector<2x8x8xf32> -> vector<2x8x8xf32>
    "tpu.trace_stop"() : () -> ()
    %185 = arith.addf %184, %25 : vector<2x8x8xf32>
    %cst_55 = arith.constant dense<0xFF800000> : vector<2x8xf32>
    %186 = vector.multi_reduction <maximumf>, %185, %cst_55 [2] : vector<2x8x8xf32> to vector<2x8xf32>
    %187 = vector.shape_cast %186 : vector<2x8xf32> to vector<2x8x1xf32>
    %188 = vector.broadcast %187 : vector<2x8x1xf32> to vector<2x8x8xf32>
    %189 = arith.subf %185, %188 : vector<2x8x8xf32>
    %190 = math.exp %189 : vector<2x8x8xf32>
    %cst_56 = arith.constant dense<0.000000e+00> : vector<2x8xf32>
    %191 = vector.multi_reduction <add>, %190, %cst_56 [2] : vector<2x8x8xf32> to vector<2x8xf32>
    %192 = vector.shape_cast %191 : vector<2x8xf32> to vector<2x8x1xf32>
    %193 = tpu.reciprocal %192 {approx = true} : vector<2x8x1xf32> -> vector<2x8x1xf32>
    %194 = vector.broadcast %193 : vector<2x8x1xf32> to vector<2x8x8xf32>
    %195 = arith.mulf %190, %194 : vector<2x8x8xf32>
    %196 = vector.extract_strided_slice %36 {offsets = [0, 8, 0, 0], sizes = [2, 1, 8, 96], strides = [1, 1, 1, 1]} : vector<2x12x8x96xf32> to vector<2x1x8x96xf32>
    %197 = vector.shape_cast %196 : vector<2x1x8x96xf32> to vector<2x8x96xf32>
    "tpu.trace_start"() <{level = 10 : i32, message = "bqk,bkd->bqd"}> : () -> ()
    %cst_57 = arith.constant dense<0.000000e+00> : vector<2x8x96xf32>
    %198 = tpu.matmul %195, %197, %cst_57 {dimension_numbers = #tpu.dot_dimension_numbers<[2], [1], [1], [2], [0, 0, 0, 1, 1, 2], [0], [0]>} : vector<2x8x8xf32>, vector<2x8x96xf32>, vector<2x8x96xf32> -> vector<2x8x96xf32>
    "tpu.trace_stop"() : () -> ()
    %199 = arith.addf %181, %198 : vector<2x8x96xf32>
    %200 = vector.extract_strided_slice %31 {offsets = [0, 9, 0, 0], sizes = [2, 1, 8, 96], strides = [1, 1, 1, 1]} : vector<2x12x8x96xf32> to vector<2x1x8x96xf32>
    %201 = vector.shape_cast %200 : vector<2x1x8x96xf32> to vector<2x8x96xf32>
    "tpu.trace_start"() <{level = 10 : i32, message = "bqd,bkd->bqk"}> : () -> ()
    %cst_58 = arith.constant dense<0.000000e+00> : vector<2x8x8xf32>
    %202 = tpu.matmul %17, %201, %cst_58 {dimension_numbers = #tpu.dot_dimension_numbers<[2], [2], [1], [1], [0, 0, 0, 1, 1, 1], [0], [0]>} : vector<2x8x96xf32>, vector<2x8x96xf32>, vector<2x8x8xf32> -> vector<2x8x8xf32>
    "tpu.trace_stop"() : () -> ()
    %203 = arith.addf %202, %25 : vector<2x8x8xf32>
    %cst_59 = arith.constant dense<0xFF800000> : vector<2x8xf32>
    %204 = vector.multi_reduction <maximumf>, %203, %cst_59 [2] : vector<2x8x8xf32> to vector<2x8xf32>
    %205 = vector.shape_cast %204 : vector<2x8xf32> to vector<2x8x1xf32>
    %206 = vector.broadcast %205 : vector<2x8x1xf32> to vector<2x8x8xf32>
    %207 = arith.subf %203, %206 : vector<2x8x8xf32>
    %208 = math.exp %207 : vector<2x8x8xf32>
    %cst_60 = arith.constant dense<0.000000e+00> : vector<2x8xf32>
    %209 = vector.multi_reduction <add>, %208, %cst_60 [2] : vector<2x8x8xf32> to vector<2x8xf32>
    %210 = vector.shape_cast %209 : vector<2x8xf32> to vector<2x8x1xf32>
    %211 = tpu.reciprocal %210 {approx = true} : vector<2x8x1xf32> -> vector<2x8x1xf32>
    %212 = vector.broadcast %211 : vector<2x8x1xf32> to vector<2x8x8xf32>
    %213 = arith.mulf %208, %212 : vector<2x8x8xf32>
    %214 = vector.extract_strided_slice %36 {offsets = [0, 9, 0, 0], sizes = [2, 1, 8, 96], strides = [1, 1, 1, 1]} : vector<2x12x8x96xf32> to vector<2x1x8x96xf32>
    %215 = vector.shape_cast %214 : vector<2x1x8x96xf32> to vector<2x8x96xf32>
    "tpu.trace_start"() <{level = 10 : i32, message = "bqk,bkd->bqd"}> : () -> ()
    %cst_61 = arith.constant dense<0.000000e+00> : vector<2x8x96xf32>
    %216 = tpu.matmul %213, %215, %cst_61 {dimension_numbers = #tpu.dot_dimension_numbers<[2], [1], [1], [2], [0, 0, 0, 1, 1, 2], [0], [0]>} : vector<2x8x8xf32>, vector<2x8x96xf32>, vector<2x8x96xf32> -> vector<2x8x96xf32>
    "tpu.trace_stop"() : () -> ()
    %217 = arith.addf %199, %216 : vector<2x8x96xf32>
    %218 = vector.extract_strided_slice %31 {offsets = [0, 10, 0, 0], sizes = [2, 1, 8, 96], strides = [1, 1, 1, 1]} : vector<2x12x8x96xf32> to vector<2x1x8x96xf32>
    %219 = vector.shape_cast %218 : vector<2x1x8x96xf32> to vector<2x8x96xf32>
    "tpu.trace_start"() <{level = 10 : i32, message = "bqd,bkd->bqk"}> : () -> ()
    %cst_62 = arith.constant dense<0.000000e+00> : vector<2x8x8xf32>
    %220 = tpu.matmul %17, %219, %cst_62 {dimension_numbers = #tpu.dot_dimension_numbers<[2], [2], [1], [1], [0, 0, 0, 1, 1, 1], [0], [0]>} : vector<2x8x96xf32>, vector<2x8x96xf32>, vector<2x8x8xf32> -> vector<2x8x8xf32>
    "tpu.trace_stop"() : () -> ()
    %221 = arith.addf %220, %25 : vector<2x8x8xf32>
    %cst_63 = arith.constant dense<0xFF800000> : vector<2x8xf32>
    %222 = vector.multi_reduction <maximumf>, %221, %cst_63 [2] : vector<2x8x8xf32> to vector<2x8xf32>
    %223 = vector.shape_cast %222 : vector<2x8xf32> to vector<2x8x1xf32>
    %224 = vector.broadcast %223 : vector<2x8x1xf32> to vector<2x8x8xf32>
    %225 = arith.subf %221, %224 : vector<2x8x8xf32>
    %226 = math.exp %225 : vector<2x8x8xf32>
    %cst_64 = arith.constant dense<0.000000e+00> : vector<2x8xf32>
    %227 = vector.multi_reduction <add>, %226, %cst_64 [2] : vector<2x8x8xf32> to vector<2x8xf32>
    %228 = vector.shape_cast %227 : vector<2x8xf32> to vector<2x8x1xf32>
    %229 = tpu.reciprocal %228 {approx = true} : vector<2x8x1xf32> -> vector<2x8x1xf32>
    %230 = vector.broadcast %229 : vector<2x8x1xf32> to vector<2x8x8xf32>
    %231 = arith.mulf %226, %230 : vector<2x8x8xf32>
    %232 = vector.extract_strided_slice %36 {offsets = [0, 10, 0, 0], sizes = [2, 1, 8, 96], strides = [1, 1, 1, 1]} : vector<2x12x8x96xf32> to vector<2x1x8x96xf32>
    %233 = vector.shape_cast %232 : vector<2x1x8x96xf32> to vector<2x8x96xf32>
    "tpu.trace_start"() <{level = 10 : i32, message = "bqk,bkd->bqd"}> : () -> ()
    %cst_65 = arith.constant dense<0.000000e+00> : vector<2x8x96xf32>
    %234 = tpu.matmul %231, %233, %cst_65 {dimension_numbers = #tpu.dot_dimension_numbers<[2], [1], [1], [2], [0, 0, 0, 1, 1, 2], [0], [0]>} : vector<2x8x8xf32>, vector<2x8x96xf32>, vector<2x8x96xf32> -> vector<2x8x96xf32>
    "tpu.trace_stop"() : () -> ()
    %235 = arith.addf %217, %234 : vector<2x8x96xf32>
    %236 = vector.extract_strided_slice %31 {offsets = [0, 11, 0, 0], sizes = [2, 1, 8, 96], strides = [1, 1, 1, 1]} : vector<2x12x8x96xf32> to vector<2x1x8x96xf32>
    %237 = vector.shape_cast %236 : vector<2x1x8x96xf32> to vector<2x8x96xf32>
    "tpu.trace_start"() <{level = 10 : i32, message = "bqd,bkd->bqk"}> : () -> ()
    %cst_66 = arith.constant dense<0.000000e+00> : vector<2x8x8xf32>
    %238 = tpu.matmul %17, %237, %cst_66 {dimension_numbers = #tpu.dot_dimension_numbers<[2], [2], [1], [1], [0, 0, 0, 1, 1, 1], [0], [0]>} : vector<2x8x96xf32>, vector<2x8x96xf32>, vector<2x8x8xf32> -> vector<2x8x8xf32>
    "tpu.trace_stop"() : () -> ()
    %239 = arith.addf %238, %25 : vector<2x8x8xf32>
    %cst_67 = arith.constant dense<0xFF800000> : vector<2x8xf32>
    %240 = vector.multi_reduction <maximumf>, %239, %cst_67 [2] : vector<2x8x8xf32> to vector<2x8xf32>
    %241 = vector.shape_cast %240 : vector<2x8xf32> to vector<2x8x1xf32>
    %242 = vector.broadcast %241 : vector<2x8x1xf32> to vector<2x8x8xf32>
    %243 = arith.subf %239, %242 : vector<2x8x8xf32>
    %244 = math.exp %243 : vector<2x8x8xf32>
    %cst_68 = arith.constant dense<0.000000e+00> : vector<2x8xf32>
    %245 = vector.multi_reduction <add>, %244, %cst_68 [2] : vector<2x8x8xf32> to vector<2x8xf32>
    %246 = vector.shape_cast %245 : vector<2x8xf32> to vector<2x8x1xf32>
    %247 = tpu.reciprocal %246 {approx = true} : vector<2x8x1xf32> -> vector<2x8x1xf32>
    %248 = vector.broadcast %247 : vector<2x8x1xf32> to vector<2x8x8xf32>
    %249 = arith.mulf %244, %248 : vector<2x8x8xf32>
    %250 = vector.extract_strided_slice %36 {offsets = [0, 11, 0, 0], sizes = [2, 1, 8, 96], strides = [1, 1, 1, 1]} : vector<2x12x8x96xf32> to vector<2x1x8x96xf32>
    %251 = vector.shape_cast %250 : vector<2x1x8x96xf32> to vector<2x8x96xf32>
    "tpu.trace_start"() <{level = 10 : i32, message = "bqk,bkd->bqd"}> : () -> ()
    %cst_69 = arith.constant dense<0.000000e+00> : vector<2x8x96xf32>
    %252 = tpu.matmul %249, %251, %cst_69 {dimension_numbers = #tpu.dot_dimension_numbers<[2], [1], [1], [2], [0, 0, 0, 1, 1, 2], [0], [0]>} : vector<2x8x8xf32>, vector<2x8x96xf32>, vector<2x8x96xf32> -> vector<2x8x96xf32>
    "tpu.trace_stop"() : () -> ()
    %253 = arith.addf %235, %252 : vector<2x8x96xf32>
    %254 = vector.shape_cast %253 : vector<2x8x96xf32> to vector<16x96xf32>
    %c0_70 = arith.constant 0 : index
    %c0_71 = arith.constant 0 : index
    %255 = vector.load %arg10[%c0_70, %c0_71] : memref<96x96xf32, #tpu.memory_space<vmem>>, vector<96x96xf32>
    %cst_72 = arith.constant dense<0.000000e+00> : vector<16x96xf32>
    %256 = tpu.matmul %254, %255, %cst_72 {dimension_numbers = #tpu.dot_dimension_numbers<[1], [0], [0], [1], [0, 0, 1, 1], [], []>} : vector<16x96xf32>, vector<96x96xf32>, vector<16x96xf32> -> vector<16x96xf32>
    %c0_73 = arith.constant 0 : index
    %c0_74 = arith.constant 0 : index
    %257 = vector.load %arg11[%c0_73, %c0_74] : memref<1x96xf32, #tpu.memory_space<vmem>>, vector<1x96xf32>
    %258 = vector.broadcast %257 : vector<1x96xf32> to vector<16x96xf32>
    %259 = arith.addf %256, %258 : vector<16x96xf32>
    %c0_75 = arith.constant 0 : index
    %c0_76 = arith.constant 0 : index
    %260 = vector.load %arg3[%c0_75, %c0_76] : memref<96x96xf32, #tpu.memory_space<vmem>>, vector<96x96xf32>
    %261 = arith.addf %1, %259 : vector<16x96xf32>
    %c0_77 = arith.constant 0 : index
    %c0_78 = arith.constant 0 : index
    %262 = vector.load %arg12[%c0_77, %c0_78] : memref<1x96xf32, #tpu.memory_space<vmem>>, vector<1x96xf32>
    %c0_79 = arith.constant 0 : index
    %c0_80 = arith.constant 0 : index
    %263 = vector.load %arg13[%c0_79, %c0_80] : memref<1x96xf32, #tpu.memory_space<vmem>>, vector<1x96xf32>
    %cst_81 = arith.constant dense<0.000000e+00> : vector<16x96xf32>
    %264 = tpu.matmul %261, %260, %cst_81 {dimension_numbers = #tpu.dot_dimension_numbers<[1], [0], [0], [1], [0, 0, 1, 1], [], []>} : vector<16x96xf32>, vector<96x96xf32>, vector<16x96xf32> -> vector<16x96xf32>
    %265 = arith.subf %261, %264 : vector<16x96xf32>
    %266 = arith.mulf %265, %265 : vector<16x96xf32>
    %cst_82 = arith.constant dense<0.000000e+00> : vector<16x96xf32>
    %267 = tpu.matmul %266, %260, %cst_82 {dimension_numbers = #tpu.dot_dimension_numbers<[1], [0], [0], [1], [0, 0, 1, 1], [], []>} : vector<16x96xf32>, vector<96x96xf32>, vector<16x96xf32> -> vector<16x96xf32>
    %cst_83 = arith.constant 9.99999974E-6 : f32
    %268 = vector.broadcast %cst_83 : f32 to vector<16x96xf32>
    %269 = arith.addf %267, %268 : vector<16x96xf32>
    %270 = math.rsqrt %269 : vector<16x96xf32>
    %271 = arith.mulf %265, %270 : vector<16x96xf32>
    %272 = vector.broadcast %262 : vector<1x96xf32> to vector<16x96xf32>
    %273 = arith.mulf %271, %272 : vector<16x96xf32>
    %274 = vector.broadcast %263 : vector<1x96xf32> to vector<16x96xf32>
    %275 = arith.addf %273, %274 : vector<16x96xf32>
    %c0_84 = arith.constant 0 : index
    %c0_85 = arith.constant 0 : index
    %276 = vector.load %arg14[%c0_84, %c0_85] : memref<96x192xf32, #tpu.memory_space<vmem>>, vector<96x192xf32>
    %cst_86 = arith.constant dense<0.000000e+00> : vector<16x192xf32>
    %277 = tpu.matmul %275, %276, %cst_86 {dimension_numbers = #tpu.dot_dimension_numbers<[1], [0], [0], [1], [0, 0, 1, 1], [], []>} : vector<16x96xf32>, vector<96x192xf32>, vector<16x192xf32> -> vector<16x192xf32>
    %c0_87 = arith.constant 0 : index
    %c0_88 = arith.constant 0 : index
    %278 = vector.load %arg15[%c0_87, %c0_88] : memref<1x192xf32, #tpu.memory_space<vmem>>, vector<1x192xf32>
    %279 = vector.broadcast %278 : vector<1x192xf32> to vector<16x192xf32>
    %280 = arith.addf %277, %279 : vector<16x192xf32>
    %cst_89 = arith.constant 0.000000e+00 : f32
    %281 = vector.broadcast %cst_89 : f32 to vector<16x192xf32>
    %282 = arith.maximumf %280, %281 : vector<16x192xf32>
    %c0_90 = arith.constant 0 : index
    %c0_91 = arith.constant 0 : index
    %283 = vector.load %arg16[%c0_90, %c0_91] : memref<192x96xf32, #tpu.memory_space<vmem>>, vector<192x96xf32>
    %cst_92 = arith.constant dense<0.000000e+00> : vector<16x96xf32>
    %284 = tpu.matmul %282, %283, %cst_92 {dimension_numbers = #tpu.dot_dimension_numbers<[1], [0], [0], [1], [0, 0, 1, 1], [], []>} : vector<16x192xf32>, vector<192x96xf32>, vector<16x96xf32> -> vector<16x96xf32>
    %c0_93 = arith.constant 0 : index
    %c0_94 = arith.constant 0 : index
    %285 = vector.load %arg17[%c0_93, %c0_94] : memref<1x96xf32, #tpu.memory_space<vmem>>, vector<1x96xf32>
    %286 = vector.broadcast %285 : vector<1x96xf32> to vector<16x96xf32>
    %287 = arith.addf %284, %286 : vector<16x96xf32>
    %288 = arith.addf %275, %287 : vector<16x96xf32>
    %c0_95 = arith.constant 0 : index
    %c0_96 = arith.constant 0 : index
    %289 = vector.load %arg18[%c0_95, %c0_96] : memref<1x96xf32, #tpu.memory_space<vmem>>, vector<1x96xf32>
    %c0_97 = arith.constant 0 : index
    %c0_98 = arith.constant 0 : index
    %290 = vector.load %arg19[%c0_97, %c0_98] : memref<1x96xf32, #tpu.memory_space<vmem>>, vector<1x96xf32>
    %cst_99 = arith.constant dense<0.000000e+00> : vector<16x96xf32>
    %291 = tpu.matmul %288, %260, %cst_99 {dimension_numbers = #tpu.dot_dimension_numbers<[1], [0], [0], [1], [0, 0, 1, 1], [], []>} : vector<16x96xf32>, vector<96x96xf32>, vector<16x96xf32> -> vector<16x96xf32>
    %292 = arith.subf %288, %291 : vector<16x96xf32>
    %293 = arith.mulf %292, %292 : vector<16x96xf32>
    %cst_100 = arith.constant dense<0.000000e+00> : vector<16x96xf32>
    %294 = tpu.matmul %293, %260, %cst_100 {dimension_numbers = #tpu.dot_dimension_numbers<[1], [0], [0], [1], [0, 0, 1, 1], [], []>} : vector<16x96xf32>, vector<96x96xf32>, vector<16x96xf32> -> vector<16x96xf32>
    %cst_101 = arith.constant 9.99999974E-6 : f32
    %295 = vector.broadcast %cst_101 : f32 to vector<16x96xf32>
    %296 = arith.addf %294, %295 : vector<16x96xf32>
    %297 = math.rsqrt %296 : vector<16x96xf32>
    %298 = arith.mulf %292, %297 : vector<16x96xf32>
    %299 = vector.broadcast %289 : vector<1x96xf32> to vector<16x96xf32>
    %300 = arith.mulf %298, %299 : vector<16x96xf32>
    %301 = vector.broadcast %290 : vector<1x96xf32> to vector<16x96xf32>
    %302 = arith.addf %300, %301 : vector<16x96xf32>
    %303 = vector.shape_cast %302 : vector<16x96xf32> to vector<2x8x96xf32>
    %c0_102 = arith.constant 0 : index
    %c0_103 = arith.constant 0 : index
    %c0_104 = arith.constant 0 : index
    %304 = vector.load %arg20[%c0_102, %c0_103, %c0_104] : memref<2x8x96xf32, #tpu.memory_space<vmem>>, vector<2x8x96xf32>
    tpu.vector_store %arg20[%c0_102, %c0_103, %c0_104], %303 {strides = array<i32>} : memref<2x8x96xf32, #tpu.memory_space<vmem>>, vector<2x8x96xf32>,
    return
  }
}

</mosaic_0001>

<bundles_post_ra>
// kernel: mpcat_forward_pallas.1
= control target key start
LH: loop header
LB: loop body
LE: loop exit
PB: predicated region body
PF: predicated region fallthrough
CT: control target
= control target key end

     0   :  { %s7613_s0 = inlined_call_operand.vmem [shape: f32[2,8,96], index: 0, kind: input, shape index: {}]   ;;  %s7614_s1 = inlined_call_operand.vmem [shape: f32[2,8], index: 1, kind: input, shape index: {}]   ;;  %s7615_s2 = inlined_call_operand.vmem [shape: f32[12,96], index: 2, kind: input, shape index: {}]   ;;  %s7616_s3 = inlined_call_operand.vmem [shape: f32[96,96], index: 3, kind: input, shape index: {}]   ;;  %s7617_s4 = inlined_call_operand.hbm [shape: f32[96,96], index: 4, kind: input, shape index: {}]   ;;  %s7618_s5 = inlined_call_operand.vmem [shape: f32[1,96], index: 5, kind: input, shape index: {}]   ;;  %s7619_s6 = inlined_call_operand.hbm [shape: f32[96,96], index: 6, kind: input, shape index: {}]   ;;  %s7620_s7 = inlined_call_operand.vmem [shape: f32[1,96], index: 7, kind: input, shape index: {}]   ;;  %s7621_s8 = inlined_call_operand.hbm [shape: f32[96,96], index: 8, kind: input, shape index: {}]   ;;  %s7622_s9 = inlined_call_operand.vmem [shape: f32[1,96], index: 9, kind: input, shape index: {}]   ;;  %s7623_s10 = inlined_call_operand.hbm [shape: f32[96,96], index: 10, kind: input, shape index: {}]   ;;  %s7624_s11 = inlined_call_operand.vmem [shape: f32[1,96], index: 11, kind: input, shape index: {}]   ;;  %s7625_s12 = inlined_call_operand.vmem [shape: f32[1,96], index: 12, kind: input, shape index: {}]   ;;  %s7626_s13 = inlined_call_operand.vmem [shape: f32[1,96], index: 13, kind: input, shape index: {}]   ;;  %s7627_s14 = inlined_call_operand.hbm [shape: f32[96,192], index: 14, kind: input, shape index: {}]   ;;  %s7628_s15 = inlined_call_operand.vmem [shape: f32[1,192], index: 15, kind: input, shape index: {}]   ;;  %s7629_s16 = inlined_call_operand.hbm [shape: f32[192,96], index: 16, kind: input, shape index: {}]   ;;  %s7630_s17 = inlined_call_operand.vmem [shape: f32[1,96], index: 17, kind: input, shape index: {}]   ;;  %s7631_s18 = inlined_call_operand.vmem [shape: f32[1,96], index: 18, kind: input, shape index: {}]   ;;  %s7632_s19 = inlined_call_operand.vmem [shape: f32[1,96], index: 19, kind: input, shape index: {}]   ;;  %s7633_s20 = inlined_call_operand.vmem [shape: f32[2,8,96], index: 20, kind: output, shape index: {}]  }
   0x1   :  { %7639 = sst [smem:[#allocation16_spill]] %s7613_s0 }
   0x2   :  { %7640 = sst [smem:[#allocation17_spill]] %s7614_s1 }
   0x3   :  { %7641 = sst [smem:[#allocation18_spill]] %s7615_s2 }
   0x4   :  { %7642 = sst [smem:[#allocation19_spill]] %s7616_s3 }
   0x5   :  { %7643 = sst [smem:[#allocation20_spill]] %s7617_s4 }
   0x6   :  { %7644 = sst [smem:[#allocation21_spill]] %s7633_s20 }
   0x7   :  { %25 = vsyncpa [#allocation3], 0 }
   0x8   :  { %26 = vsyncpa [#allocation5], 0 }
   0x9   :  { %27 = vsyncpa [#allocation8], 0 }
   0xa   :  { %28 = vsyncpa [#allocation11], 0  ;;  %s6514_s1 = smov [#allocation4]   ;;  %s6515_s23 = smov [#allocation7]  }
   0xb   :  { %s56_s22 = sshll.u32 %s6514_s1, 4  ;;  %s84_s24 = sshll.u32 %s6515_s23, 4  ;;  %s57_s22 = int_to_ptr.vmem [resolvable:$true] %s56_s22  ;;  %s6633_s24 = int_to_ptr.vmem [resolvable:$true] %s84_s24 }
   0xc   :  { %s6374_s3 = scalar_lea.hbm %s7619_s6, 1536 }
   0xd   :  { %p6375_p0 = scmp.ne.s32.totalorder %s7619_s6, %s6374_s3  ;;  %p6378_p1 = scmp.lt.u32.totalorder %s6374_s3, %s7619_s6 }
   0xf   :  { %p6380_p2 = pnand %p6378_p1, %p6375_p0 }
  0x11   :  { %6383 = shalt.err (!%p6380_p2)
}
  0x12   :  { %s6384_s29 = scalar_lea.vmem %s57_s22, 1536  ;;  %p6389_p4 = scmp.lt.s32.totalorder %s57_s22, %s57_s22 }
  0x13   :  { %p6385_p3 = scmp.ne.s32.totalorder %s57_s22, %s6384_s29  ;;  %p6390_p5 = scmp.lt.s32.totalorder %s6384_s29, %s6384_s29 }
  0x15   :  { %p6391_p6 = por %p6390_p5, %p6389_p4 }
  0x17   :  { %p6392_p7 = pnand %p6391_p6, %p6385_p3 }
  0x19   :  { %6395 = shalt.err (!%p6392_p7)
}
  0x1a   :  { %s6516_s30 = smov 128   ;;  %s6517_s0 = smov 8  }
  0x1b   :  { %62 = dma.hbm_to_vmem [thread:$0]  %s7619_s6, 1536, %s57_s22, [#allocation5], %s6516_s30, %s6516_s30, %s6517_s0  }
  0x1c   :  { %s6396_s25 = scalar_lea.hbm %s7623_s10, 1536 }
  0x1d   :  { %p6397_p8 = scmp.ne.s32.totalorder %s7623_s10, %s6396_s25  ;;  %p6400_p9 = scmp.lt.u32.totalorder %s6396_s25, %s7623_s10 }
  0x1f   :  { %p6402_p10 = pnand %p6400_p9, %p6397_p8 }
  0x21   :  { %6405 = shalt.err (!%p6402_p10)
}
  0x22   :  { %s6406_s4 = scalar_lea.vmem %s6633_s24, 1536  ;;  %p6411_p12 = scmp.lt.s32.totalorder %s6633_s24, %s6633_s24 }
  0x23   :  { %p6407_p11 = scmp.ne.s32.totalorder %s6633_s24, %s6406_s4  ;;  %p6412_p13 = scmp.lt.s32.totalorder %s6406_s4, %s6406_s4 }
  0x25   :  { %p6413_p0 = por %p6412_p13, %p6411_p12 }
  0x27   :  { %p6414_p1 = pnand %p6413_p0, %p6407_p11 }
  0x29   :  { %6417 = shalt.err (!%p6414_p1)
}
  0x2a   :  { %90 = dma.hbm_to_vmem [thread:$0]  %s7623_s10, 1536, %s6633_s24, [#allocation8], %s6516_s30, %s6516_s30, %s6517_s0  }
  0x2b   :  { %s6518_s29 = smov [#allocation2]   ;;  %s6519_s1 = smov [#allocation6]  }
  0x2c   :  { %s42_s21 = sshll.u32 %s6518_s29, 4  ;;  %s70_s23 = sshll.u32 %s6519_s1, 4  ;;  %s43_s21 = int_to_ptr.vmem [resolvable:$true] %s42_s21  ;;  %s6670_s23 = int_to_ptr.vmem [resolvable:$true] %s70_s23 }
  0x2d   :  { %s7645_s3 = sld [smem:[#allocation20_spill]] }
  0x33   :  { %s6418_s26 = scalar_lea.hbm %s7645_s3, 1536 }
  0x34   :  { %p6419_p2 = scmp.ne.s32.totalorder %s7645_s3, %s6418_s26  ;;  %p6422_p3 = scmp.lt.u32.totalorder %s6418_s26, %s7645_s3 }
  0x36   :  { %p6424_p4 = pnand %p6422_p3, %p6419_p2 }
  0x38   :  { %6427 = shalt.err (!%p6424_p4)
}
  0x39   :  { %s6428_s10 = scalar_lea.vmem %s43_s21, 1536  ;;  %p6433_p6 = scmp.lt.s32.totalorder %s43_s21, %s43_s21 }
  0x3a   :  { %p6429_p5 = scmp.ne.s32.totalorder %s43_s21, %s6428_s10  ;;  %p6434_p7 = scmp.lt.s32.totalorder %s6428_s10, %s6428_s10 }
  0x3c   :  { %p6435_p8 = por %p6434_p7, %p6433_p6 }
  0x3e   :  { %p6436_p9 = pnand %p6435_p8, %p6429_p5 }
  0x40   :  { %6439 = shalt.err (!%p6436_p9)
}
  0x41   :  { %48 = dma.hbm_to_vmem [thread:$0]  %s7645_s3, 1536, %s43_s21, [#allocation3], %s6516_s30, %s6516_s30, %s6517_s0  }
  0x42   :  { %s6440_s20 = scalar_lea.hbm %s7621_s8, 1536 }
  0x43   :  { %p6441_p10 = scmp.ne.s32.totalorder %s7621_s8, %s6440_s20  ;;  %p6444_p11 = scmp.lt.u32.totalorder %s6440_s20, %s7621_s8 }
  0x45   :  { %p6446_p12 = pnand %p6444_p11, %p6441_p10 }
  0x47   :  { %6449 = shalt.err (!%p6446_p12)
}
  0x48   :  { %s6450_s27 = scalar_lea.vmem %s6670_s23, 1536  ;;  %p6455_p0 = scmp.lt.s32.totalorder %s6670_s23, %s6670_s23 }
  0x49   :  { %p6451_p13 = scmp.ne.s32.totalorder %s6670_s23, %s6450_s27  ;;  %p6456_p1 = scmp.lt.s32.totalorder %s6450_s27, %s6450_s27 }
  0x4b   :  { %p6457_p2 = por %p6456_p1, %p6455_p0 }
  0x4d   :  { %p6458_p3 = pnand %p6457_p2, %p6451_p13 }
  0x4f   :  { %6461 = shalt.err (!%p6458_p3)
}
  0x50   :  { %76 = dma.hbm_to_vmem [thread:$0]  %s7621_s8, 1536, %s6670_s23, [#allocation5], %s6516_s30, %s6516_s30, %s6517_s0  }
  0x51   :  { %s6520_s28 = smov [#allocation9]   ;;  %s6462_s6 = scalar_lea.hbm %s7627_s14, 3072 }
  0x52   :  { %s102_s4 = sshll.u32 %s6520_s28, 4  ;;  %p6463_p4 = scmp.ne.s32.totalorder %s7627_s14, %s6462_s6  ;;  %s103_s4 = int_to_ptr.vmem [resolvable:$true] %s102_s4 }
  0x53   :  { %p6466_p5 = scmp.lt.u32.totalorder %s6462_s6, %s7627_s14 }
  0x55   :  { %p6468_p6 = pnand %p6466_p5, %p6463_p4 }
  0x57   :  { %6471 = shalt.err (!%p6468_p6)
}
  0x58   :  { %s6472_s2 = scalar_lea.vmem %s103_s4, 3072  ;;  %p6477_p8 = scmp.lt.s32.totalorder %s103_s4, %s103_s4 }
  0x59   :  { %p6473_p7 = scmp.ne.s32.totalorder %s103_s4, %s6472_s2  ;;  %p6478_p9 = scmp.lt.s32.totalorder %s6472_s2, %s6472_s2 }
  0x5b   :  { %p6479_p10 = por %p6478_p9, %p6477_p8 }
  0x5d   :  { %p6480_p11 = pnand %p6479_p10, %p6473_p7 }
  0x5f   :  { %6483 = shalt.err (!%p6480_p11)
}
  0x60   :  { %s6521_s8 = smov 256   ;;  %s6522_s23 = smov 16  }
  0x61   :  { %108 = dma.hbm_to_vmem [thread:$0]  %s7627_s14, 3072, %s103_s4, [#allocation8], %s6521_s8, %s6521_s8, %s6522_s23  }
  0x62   :  { %s6523_s27 = smov [#allocation10]   ;;  %s6484_s10 = scalar_lea.hbm %s7629_s16, 3072 }
  0x63   :  { %s116_s21 = sshll.u32 %s6523_s27, 4  ;;  %p6485_p12 = scmp.ne.s32.totalorder %s7629_s16, %s6484_s10  ;;  %s117_s21 = int_to_ptr.vmem [resolvable:$true] %s116_s21 }
  0x64   :  { %p6488_p13 = scmp.lt.u32.totalorder %s6484_s10, %s7629_s16 }
  0x66   :  { %p6490_p0 = pnand %p6488_p13, %p6485_p12 }
  0x68   :  { %6493 = shalt.err (!%p6490_p0)
}
  0x69   :  { %s6494_s20 = scalar_lea.vmem %s117_s21, 3072  ;;  %p6499_p2 = scmp.lt.s32.totalorder %s117_s21, %s117_s21 }
  0x6a   :  { %p6495_p1 = scmp.ne.s32.totalorder %s117_s21, %s6494_s20  ;;  %p6500_p3 = scmp.lt.s32.totalorder %s6494_s20, %s6494_s20 }
  0x6c   :  { %p6501_p4 = por %p6500_p3, %p6499_p2 }
  0x6e   :  { %p6502_p5 = pnand %p6501_p4, %p6495_p1 }
  0x70   :  { %6505 = shalt.err (!%p6502_p5)
}
  0x71   :  { %122 = dma.hbm_to_vmem [thread:$0]  %s7629_s16, 3072, %s117_s21, [#allocation11], %s6516_s30, %s6516_s30, %s6517_s0  }
  0x72   :  { %6506 = dma.done.wait [#allocation3], 1536  }
  0x73   :  { %6507 = vsyncadd [#allocation3], 4294965760 }
  0x74   :  { %6508 = dma.done.wait [#allocation5], 3072  }
  0x75   :  { %6509 = vsyncadd [#allocation5], 4294964224 }
  0x76   :  { %6510 = dma.done.wait [#allocation8], 4608  }
  0x77   :  { %6511 = vsyncadd [#allocation8], 4294962688 }
  0x78   :  { %6512 = dma.done.wait [#allocation11], 3072  }
  0x79   :  { %6513 = vsyncadd [#allocation11], 4294964224  ;;  %v250_v0 = vld [vmem:[#allocation4] sm:$0xff]  ;;  %v251_v1 = vld [vmem:[#allocation4 + $0x8] sm:$0xff]  ;;  %vm168_vm0 = vcmask 785408   ;;  %s7646_s0 = sld [smem:[#allocation16_spill]]  ;;  %v444_v59 = vlaneseq }
  0x7a   :  { %v252_v2 = vld [vmem:[#allocation4 + $0x10] sm:$0xff]  ;;  %v5981_v3 = vpack.c.bf16 %v251_v1, %v250_v0  ;;  %v253_v4 = vld [vmem:[#allocation4 + $0x18] sm:$0xff]  ;;  %v149_v5 = vld [vmem:[#allocation2] sm:$0xff]  ;;  %v6524_v56 = vmov 0.0   ;;  %vm6525_vm1 = vmmov 0   ;;  %s7647_s25 = sld [smem:[#allocation18_spill]] }
  0x7b   :  { %v150_v6 = vld [vmem:[#allocation2 + $0x8] sm:$0xff]  ;;  %v5985_v7 = vpack.c.bf16 %v253_v4, %v252_v2  ;;  %v254_v9 = vld [vmem:[#allocation4 + $0x20] sm:$0xff]  ;;  %v151_v11 = vld [vmem:[#allocation2 + $0x10] sm:$0xff]  ;;  %v6526_v57 = vmov 1966171168   ;;  %v6752_v61 = vshrl.u32 %v444_v59, 7 }
  0x7c   :  { %v5957_v8 = vpack.c.bf16 %v150_v6, %v149_v5  ;;  %v255_v10 = vld [vmem:[#allocation4 + $0x28] sm:$0xff]  ;;  %5982 = vmatprep.subr.bf16.mxu1 %v5981_v3  ;;  %v152_v12 = vld [vmem:[#allocation2 + $0x18] sm:$0xff]  ;;  %v153_v14 = vld [vmem:[#allocation2 + $0x20] sm:$0xff]  ;;  %v442_v58 = vunpack.c.l.s4 %v6526_v57  ;;  %s7648_s6 = sld [smem:[#allocation17_spill]]  ;;  %vm810_vm2 = vcmask 64512   ;;  %s7649_s20 = sld [smem:[#allocation19_spill]] }
  0x7d   :  { %5984 = vmatpush3.bf16.msra.mxu1 %v5981_v3  ;;  %v5961_v13 = vpack.c.bf16 %v152_v12, %v151_v11  ;;  %v154_v15 = vld [vmem:[#allocation2 + $0x28] sm:$0xff]  ;;  %v5989_v16 = vpack.c.bf16 %v255_v10, %v254_v9  ;;  %v256_v17 = vld [vmem:[#allocation4 + $0x30] sm:$0xff]  ;;  %v257_v18 = vld [vmem:[#allocation4 + $0x38] sm:$0xff]  ;;  %v6763_v2 = vsub.s32 0, %v6752_v61  ;;  %vm4909_vm3 = vcmask 523264  }
  0x7e   :  { %5958 = vmatprep.subr.bf16.mxu0 %v5957_v8  ;;  %5986 = vmatprep.subr.bf16.mxu1 %v5985_v7  ;;  %v5965_v19 = vpack.c.bf16 %v154_v15, %v153_v14  ;;  %v155_v20 = vld [vmem:[#allocation2 + $0x30] sm:$0xff]  ;;  %v156_v21 = vld [vmem:[#allocation2 + $0x38] sm:$0xff]  ;;  %v5993_v23 = vpack.c.bf16 %v257_v18, %v256_v17  ;;  %v258_v24 = vld [vmem:[#allocation4 + $0x40] sm:$0xff]  ;;  %v443_v60 = vunpack.c.0.s8 %v442_v58 }
  0x7f   :  { %5960 = vmatpush3.bf16.msra.mxu0 %v5957_v8  ;;  %v147_v22 = vld [vmem:[%s7646_s0] sm:$0xff]  ;;  %v259_v25 = vld [vmem:[#allocation4 + $0x48] sm:$0xff]  ;;  %v5969_v26 = vpack.c.bf16 %v156_v21, %v155_v20  ;;  %v260_v30 = vld [vmem:[#allocation4 + $0x50] sm:$0xff] }
  0x80   :  { %5962 = vmatprep.subr.bf16.mxu0 %v5961_v13  ;;  %5552 = vmatprep.mubr.msk.f32.mxu1 %vm168_vm0, %v147_v22  ;;  %v157_v27 = vld [vmem:[#allocation2 + $0x40] sm:$0xff]  ;;  %v158_v28 = vld [vmem:[#allocation2 + $0x48] sm:$0xff]  ;;  %v5997_v29 = vpack.c.bf16 %v259_v25, %v258_v24  ;;  %v261_v31 = vld [vmem:[#allocation4 + $0x58] sm:$0xff]  ;;  %v6755_v62 = vsub.s32 %v443_v60, %v6752_v61 }
  0x81   :  { %5988 = vmatpush3.bf16.msra.mxu1 %v5985_v7  ;;  %5525 = vmatprep.mubr.msk.f32.mxu0 %vm168_vm0, %v147_v22  ;;  %v5973_v32 = vpack.c.bf16 %v158_v28, %v157_v27  ;;  %v159_v33 = vld [vmem:[#allocation2 + $0x50] sm:$0xff]  ;;  %v160_v34 = vld [vmem:[#allocation2 + $0x58] sm:$0xff]  ;;  %v6001_v35 = vpack.c.bf16 %v261_v31, %v260_v30  ;;  %v344_v37 = vld [vmem:[#allocation6] sm:$0xff] }
  0x82   :  { %5990 = vmatprep.subr.bf16.mxu1 %v5989_v16  ;;  %v5977_v36 = vpack.c.bf16 %v160_v34, %v159_v33  ;;  %v345_v38 = vld [vmem:[#allocation6 + $0x8] sm:$0xff]  ;;  %v346_v40 = vld [vmem:[#allocation6 + $0x10] sm:$0xff]  ;;  %v347_v41 = vld [vmem:[#allocation6 + $0x18] sm:$0xff] }
  0x83   :  { %5964 = vmatpush3.bf16.msra.mxu0 %v5961_v13  ;;  %v6005_v39 = vpack.c.bf16 %v345_v38, %v344_v37  ;;  %v148_v42 = vld [vmem:[%s7646_s0 + $0x8] sm:$0xff]  ;;  %v6009_v43 = vpack.c.bf16 %v347_v41, %v346_v40  ;;  %v348_v44 = vld [vmem:[#allocation6 + $0x20] sm:$0xff]  ;;  %v350_v47 = vld [vmem:[#allocation6 + $0x30] sm:$0xff] }
  0x84   :  { %5966 = vmatprep.subr.bf16.mxu0 %v5965_v19  ;;  %v349_v45 = vld [vmem:[#allocation6 + $0x28] sm:$0xff]  ;;  %v351_v48 = vld [vmem:[#allocation6 + $0x38] sm:$0xff]  ;;  %v352_v50 = vld [vmem:[#allocation6 + $0x40] sm:$0xff] }
  0x85   :  { %5992 = vmatpush3.bf16.msra.mxu1 %v5989_v16  ;;  %v6013_v46 = vpack.c.bf16 %v349_v45, %v348_v44  ;;  %v6017_v49 = vpack.c.bf16 %v351_v48, %v350_v47  ;;  %v353_v51 = vld [vmem:[#allocation6 + $0x48] sm:$0xff]  ;;  %v354_v53 = vld [vmem:[#allocation6 + $0x50] sm:$0xff]  ;;  %v355_v54 = vld [vmem:[#allocation6 + $0x58] sm:$0xff] }
  0x86   :  { %5994 = vmatprep.subr.bf16.mxu1 %v5993_v23  ;;  %v6021_v52 = vpack.c.bf16 %v353_v51, %v352_v50  ;;  %v6025_v55 = vpack.c.bf16 %v355_v54, %v354_v53  ;;  %v473_v63 = vld [vmem:[%s7647_s25] sm:$0xff]  ;;  %v5200_v51 = vld.sshfl [vmem:[%s7647_s25 + $0x8] sm:$0x33 pattern:$0x75316420] }
  0x87   :  { %5968 = vmatpush3.bf16.msra.mxu0 %v5965_v19  ;;  %v484_v0 = vrot.slane %v473_v63, %v6755_v62  ;;  %v5194_v5 = vld [vmem:[%s7620_s7] ss:$0 sm:$0xff]  ;;  %v477_v20 = vcombine.high %v473_v63, %v473_v63 }
  0x88   :  { %5970 = vmatprep.subr.bf16.mxu0 %v5969_v26  ;;  %v5191_v13 = vld [vmem:[%s7618_s5] ss:$0 sm:$0xff]  ;;  %s7650_s5 = sld [smem:[#allocation21_spill]] }
  0x89   :  { %5996 = vmatpush3.bf16.msra.mxu1 %v5993_v23  ;;  %v500_v1 = vrot.slane %v484_v0, %v6755_v62  ;;  %v492_v4 = vcombine.high %v484_v0, %v484_v0  ;;  %v491_v28 = vrot.slane %v477_v20, %v6755_v62 }
  0x8a   :  { %5998 = vmatprep.subr.bf16.mxu1 %v5997_v29 }
  0x8b   :  { %5972 = vmatpush3.bf16.msra.mxu0 %v5969_v26  ;;  %v522_v3 = vcombine.high %v500_v1, %v500_v1  ;;  %v6769_v7 = vrot.slane %v500_v1, %v6763_v2  ;;  %v514_v9 = vrot.slane %v492_v4, %v6755_v62  ;;  %v493_v33 = vcombine.high %v491_v28, %v491_v28 }
  0x8c   :  { %5974 = vmatprep.subr.bf16.mxu0 %v5973_v32 }
  0x8d   :  { %6000 = vmatpush3.bf16.msra.mxu1 %v5997_v29  ;;  %v6772_v8 = vrot.slane %v522_v3, %v6763_v2  ;;  %v524_v18 = vcombine.high %v514_v9, %v514_v9  ;;  %v6797_v23 = vrot.slane %v514_v9, %v6763_v2  ;;  %v507_v29 = vrot.slane %v491_v28, %v6755_v62 }
  0x8e   :  { %6002 = vmatprep.subr.bf16.mxu1 %v6001_v35 }
  0x8f   :  { %5976 = vmatpush3.bf16.msra.mxu0 %v5973_v32  ;;  %v6800_v24 = vrot.slane %v524_v18, %v6763_v2  ;;  %v6839_v32 = vrot.slane %v507_v29, %v6763_v2 }
  0x90   :  { %5978 = vmatprep.subr.bf16.mxu0 %v5977_v36 }
  0x91   :  { %6004 = vmatpush3.bf16.msra.mxu1 %v6001_v35  ;;  %v521_v35 = vrot.slane %v493_v33, %v6755_v62 }
  0x92   :  { %5582 = vmatprep.subr.mxu1 %v6524_v56 }
  0x93   :  { %5980 = vmatpush3.bf16.msra.mxu0 %v5977_v36  ;;  %v6867_v36 = vld [vmem:[%s7622_s9] ss:$0 sm:$0xff]  ;;  %v6874_v38 = vrot.slane %v521_v35, %v6763_v2  ;;  %v525_v47 = vcombine.high %v521_v35, %v521_v35 }
  0x94   :  { %6006 = vmatprep.subr.bf16.mxu0 %v6005_v39  ;;  %5553 = vmatmul.mubr.msk.f32.vlgmr.msra.gmra.mrb[0].mxu1 %vm168_vm0, %v148_v42 }
  0x95   :  { %5584 = vmatprep.mubr.msk.f32.mxu1 %vm6525_vm1, %v6524_v56 }
  0x96   :  { %5526 = vmatmul.mubr.msk.f32.vlgmr.msra.gmra.mrb[0].mxu0 %vm168_vm0, %v148_v42 }
  0x97   :  { %6008 = vmatpush3.bf16.msra.mxu0 %v6005_v39  ;;  %5579 = vmatprep.mubr.msk.f32.mxu0 %vm168_vm0, %v147_v22 }
  0x98   :  { %6010 = vmatprep.subr.bf16.mxu0 %v6009_v43 }
  0x9b   :  { %6012 = vmatpush3.bf16.msra.mxu0 %v6009_v43  ;;  %v523_v43 = vcombine.high %v507_v29, %v507_v29 }
  0x9c   :  { %6014 = vmatprep.subr.bf16.mxu0 %v6013_v46 }
  0x9d   :  { %v6898_v45 = vrot.slane %v523_v43, %v6763_v2 }
  0x9f   :  { %6016 = vmatpush3.bf16.msra.mxu0 %v6013_v46 }
  0xa0   :  { %6018 = vmatprep.subr.bf16.mxu0 %v6017_v49 }
  0xa3   :  { %6020 = vmatpush3.bf16.msra.mxu0 %v6017_v49  ;;  %v6917_v49 = vrot.slane %v525_v47, %v6763_v2 }
  0xa4   :  { %6022 = vmatprep.subr.bf16.mxu0 %v6021_v52 }
  0xa7   :  { %6024 = vmatpush3.bf16.msra.mxu0 %v6021_v52  ;;  %v540_v52 = vrot.slane %v5200_v51, %v6755_v62 }
  0xa8   :  { %6026 = vmatprep.subr.bf16.mxu0 %v6025_v55 }
  0xa9   :  { %v6940_v54 = vrot.slane %v540_v52, %v6763_v2  ;;  %v548_v0 = vcombine.high %v540_v52, %v540_v52 }
  0xab   :  { %6028 = vmatpush3.bf16.msra.mxu0 %v6025_v55  ;;  %v533_v55 = vcombine.high %v5200_v51, %v5200_v51  ;;  %v6979_v3 = vrot.slane %v548_v0, %v6763_v2 }
  0xac   :  { %5622 = vmatprep.subr.mxu0 %v6524_v56 }
  0xad   :  { %v547_v58 = vrot.slane %v533_v55, %v6755_v62 }
  0xae   :  { %5580 = vmatmul.mubr.msk.f32.vlgmr.msra.gmra.mrb[2].mxu0 %vm168_vm0, %v148_v42 }
  0xaf   :  { %5624 = vmatprep.mubr.msk.f32.mxu0 %vm6525_vm1, %v6524_v56  ;;  %v6960_v60 = vrot.slane %v547_v58, %v6763_v2 }
 0x167   :  { %v5554_v6 = vpop.f32.mrb[0].mxu1 }
 0x168   :  { %v335_v10 = vpop.f32.mrb[1].mxu1  ;;  %v6780_v15 = vadd.f32 %v5554_v6, %v5194_v5 }
 0x169   :  { %v5527_v11 = vpop.f32.mrb[0].mxu0  ;;  %v6775_v12 = vadd.f32 %v5194_v5, %v335_v10  ;;  %v549_v5 = vcombine.high %v547_v58, %v547_v58 }
 0x16a   :  { %v241_v14 = vpop.f32.mrb[1].mxu0  ;;  %v622_v21 = vmul.f32 %v6769_v7, %v6780_v15  ;;  %v624_v22 = vmul.f32 %v6772_v8, %v6780_v15  ;;  %v6808_v25 = vadd.f32 %v5527_v11, %v5191_v13  ;;  %v623_v30 = vmul.f32 %v6797_v23, %v6780_v15 }
 0x16b   :  { %v610_v16 = vmul.f32 %v6769_v7, %v6775_v12  ;;  %v612_v17 = vmul.f32 %v6772_v8, %v6775_v12  ;;  %v6786_v19 = vadd.f32 %v5191_v13, %v241_v14  ;;  %v611_v26 = vmul.f32 %v6797_v23, %v6775_v12  ;;  %v438_v14 = vld [vmem:[%s7648_s6] sm:$0x3] }
 0x16c   :  { %v613_v27 = vmul.f32 %v6800_v24, %v6775_v12  ;;  %v625_v31 = vmul.f32 %v6800_v24, %v6780_v15  ;;  %v614_v34 = vmul.f32 %v6839_v32, %v6775_v12  ;;  %v626_v37 = vmul.f32 %v6839_v32, %v6780_v15 }
 0x16d   :  { %5583 = vmatpush3.xpose.msk.msra.mxu1 %vm168_vm0, %v610_v16  ;;  %5623 = vmatpush3.xpose.msk.msra.mxu0 %vm168_vm0, %v612_v17  ;;  %v615_v42 = vmul.f32 %v6874_v38, %v6775_v12  ;;  %v627_v44 = vmul.f32 %v6874_v38, %v6780_v15  ;;  %v616_v46 = vmul.f32 %v6898_v45, %v6775_v12 }
 0x16e   :  { %5587 = vmatprep.subr.mxu1 %v6524_v56  ;;  %5627 = vmatprep.subr.mxu0 %v6524_v56  ;;  %v628_v48 = vmul.f32 %v6898_v45, %v6780_v15  ;;  %v617_v50 = vmul.f32 %v6917_v49, %v6775_v12  ;;  %v629_v53 = vmul.f32 %v6917_v49, %v6780_v15 }
 0x16f   :  { %v618_v57 = vmul.f32 %v6940_v54, %v6775_v12  ;;  %v630_v59 = vmul.f32 %v6940_v54, %v6780_v15  ;;  %v619_v63 = vmul.f32 %v6960_v60, %v6775_v12  ;;  %v631_v1 = vmul.f32 %v6960_v60, %v6780_v15 }
 0x170   :  { %5585 = vmatmul.mubr.msk.f32.vlgmr.msra.gmra.mrb[2].mxu1 %vm168_vm0, %v6786_v19  ;;  %5625 = vmatmul.mubr.msk.f32.vlgmr.msra.gmra.mrb[4].mxu0 %vm168_vm0, %v6786_v19  ;;  %v620_v4 = vmul.f32 %v6979_v3, %v6775_v12  ;;  %v632_v6 = vmul.f32 %v6979_v3, %v6780_v15  ;;  %v6998_v9 = vrot.slane %v549_v5, %v6763_v2 }
 0x171   :  { %5588 = vmatpush3.xpose.msk.msra.mxu1 %vm168_vm0, %v622_v21  ;;  %5628 = vmatpush3.xpose.msk.msra.mxu0 %vm168_vm0, %v624_v22 }
 0x172   :  { %5589 = vmatprep.mubr.msk.f32.mxu1 %vm6525_vm1, %v6524_v56  ;;  %5629 = vmatprep.mubr.msk.f32.mxu0 %vm6525_vm1, %v6524_v56  ;;  %v621_v10 = vmul.f32 %v6998_v9, %v6775_v12  ;;  %v633_v11 = vmul.f32 %v6998_v9, %v6780_v15  ;;  %v439_v15 = vmul.f32 -1e+30, %v438_v14 }
 0x173   :  { %5592 = vmatprep.subr.mxu1 %v6524_v56  ;;  %5642 = vmatprep.subr.mxu0 %v6524_v56 }
 0x174   :  { %5590 = vmatmul.mubr.msk.f32.vlgmr.msra.gmra.mrb[4].mxu1 %vm168_vm0, %v6808_v25  ;;  %5630 = vmatmul.mubr.msk.f32.vlgmr.msra.gmra.mrb[6].mxu0 %vm168_vm0, %v6808_v25  ;;  %v447_v16 = vrot.slane %v439_v15, %v6755_v62 }
 0x175   :  { %5593 = vmatpush3.xpose.msk.msra.mxu1 %vm168_vm0, %v611_v26  ;;  %5643 = vmatpush3.xpose.msk.msra.mxu0 %vm168_vm0, %v613_v27 }
 0x176   :  { %5594 = vmatprep.mubr.msk.f32.mxu1 %vm6525_vm1, %v6524_v56  ;;  %5644 = vmatprep.mubr.msk.f32.mxu0 %vm6525_vm1, %v6524_v56  ;;  %v455_v17 = vrot.slane %v447_v16, %v6755_v62  ;;  %v448_v18 = vcombine.high %v447_v16, %v447_v16 }
 0x177   :  { %5597 = vmatprep.subr.mxu1 %v6524_v56  ;;  %5647 = vmatprep.subr.mxu0 %v6524_v56 }
 0x178   :  { %5595 = vmatmul.mubr.msk.f32.vlgmr.msra.gmra.mrb[6].mxu1 %vm168_vm0, %v6786_v19  ;;  %5645 = vmatmul.mubr.msk.f32.vlgmr.msra.gmra.mrb[8].mxu0 %vm168_vm0, %v6786_v19  ;;  %v462_v20 = vrot.slane %v448_v18, %v6755_v62 }
 0x179   :  { %5598 = vmatpush3.xpose.msk.msra.mxu1 %vm168_vm0, %v623_v30  ;;  %5648 = vmatpush3.xpose.msk.msra.mxu0 %vm168_vm0, %v625_v31 }
 0x17a   :  { %5599 = vmatprep.mubr.msk.f32.mxu1 %vm6525_vm1, %v6524_v56  ;;  %5649 = vmatprep.mubr.msk.f32.mxu0 %vm6525_vm1, %v6524_v56  ;;  %v7043_v28 = vrot.slane %v462_v20, %v6763_v2 }
 0x17b   :  { %5662 = vmatprep.subr.mxu0 %v6524_v56  ;;  %5602 = vmatprep.subr.mxu1 %v6524_v56 }
 0x17c   :  { %5600 = vmatmul.mubr.msk.f32.vlgmr.msra.gmra.mrb[8].mxu1 %vm168_vm0, %v6808_v25  ;;  %5650 = vmatmul.mubr.msk.f32.vlgmr.msra.gmra.mrb[10].mxu0 %vm168_vm0, %v6808_v25 }
 0x17d   :  { %5663 = vmatpush3.xpose.msk.msra.mxu0 %vm168_vm0, %v614_v34  ;;  %5664 = vmatprep.mubr.msk.f32.mxu0 %vm6525_vm1, %v6524_v56 }
 0x17e   :  { %5667 = vmatprep.subr.mxu0 %v6524_v56  ;;  %5604 = vmatprep.mubr.msk.f32.mxu1 %vm6525_vm1, %v6524_v56 }
 0x180   :  { %5665 = vmatmul.mubr.msk.f32.vlgmr.msra.gmra.mrb[12].mxu0 %vm168_vm0, %v6786_v19 }
 0x181   :  { %v5581_v39 = vpop.f32.mrb[2].mxu0  ;;  %5668 = vmatpush3.xpose.msk.msra.mxu0 %vm168_vm0, %v626_v37  ;;  %5669 = vmatprep.mubr.msk.f32.mxu0 %vm6525_vm1, %v6524_v56 }
 0x182   :  { %v6882_v40 = vadd.f32 %v5581_v39, %v6867_v36  ;;  %v6884_v41 = vpop.f32.mrb[3].mxu0  ;;  %5682 = vmatprep.subr.mxu0 %v6524_v56 }
 0x183   :  { %v7025_v12 = vadd.f32 %v6867_v36, %v6884_v41 }
 0x184   :  { %5670 = vmatmul.mubr.msk.f32.vlgmr.msra.gmra.mrb[14].mxu0 %vm168_vm0, %v6808_v25 }
 0x185   :  { %5683 = vmatpush3.xpose.msk.msra.mxu0 %vm168_vm0, %v615_v42  ;;  %5684 = vmatprep.mubr.msk.f32.mxu0 %vm6525_vm1, %v6524_v56  ;;  %v635_v13 = vmul.f32 %v6797_v23, %v7025_v12 }
 0x186   :  { %5687 = vmatprep.subr.mxu0 %v6524_v56 }
 0x187   :  { %5603 = vmatpush3.msra.mxu1 %v635_v13 }
 0x188   :  { %5685 = vmatmul.mubr.msk.f32.vlgmr.msra.gmra.mrb[16].mxu0 %vm168_vm0, %v6786_v19  ;;  %5607 = vmatprep.subr.mxu1 %v6524_v56 }
 0x189   :  { %5688 = vmatpush3.xpose.msk.msra.mxu0 %vm168_vm0, %v627_v44  ;;  %5689 = vmatprep.mubr.msk.f32.mxu0 %vm6525_vm1, %v6524_v56 }
 0x18a   :  { %5702 = vmatprep.subr.mxu0 %v6524_v56 }
 0x18c   :  { %5690 = vmatmul.mubr.msk.f32.vlgmr.msra.gmra.mrb[18].mxu0 %vm168_vm0, %v6808_v25 }
 0x18d   :  { %5703 = vmatpush3.xpose.msk.msra.mxu0 %vm168_vm0, %v616_v46  ;;  %5704 = vmatprep.mubr.msk.f32.mxu0 %vm6525_vm1, %v6524_v56 }
 0x18e   :  { %5707 = vmatprep.subr.mxu0 %v6524_v56 }
 0x190   :  { %5705 = vmatmul.mubr.msk.f32.vlgmr.msra.gmra.mrb[20].mxu0 %vm168_vm0, %v6786_v19 }
 0x191   :  { %5708 = vmatpush3.xpose.msk.msra.mxu0 %vm168_vm0, %v628_v48  ;;  %5709 = vmatprep.mubr.msk.f32.mxu0 %vm6525_vm1, %v6524_v56 }
 0x192   :  { %5722 = vmatprep.subr.mxu0 %v6524_v56 }
 0x194   :  { %5710 = vmatmul.mubr.msk.f32.vlgmr.msra.gmra.mrb[22].mxu0 %vm168_vm0, %v6808_v25 }
 0x195   :  { %5723 = vmatpush3.xpose.msk.msra.mxu0 %vm168_vm0, %v617_v50  ;;  %5724 = vmatprep.mubr.msk.f32.mxu0 %vm6525_vm1, %v6524_v56 }
 0x196   :  { %5727 = vmatprep.subr.mxu0 %v6524_v56 }
 0x198   :  { %5725 = vmatmul.mubr.msk.f32.vlgmr.msra.gmra.mrb[24].mxu0 %vm168_vm0, %v6786_v19 }
 0x199   :  { %5728 = vmatpush3.xpose.msk.msra.mxu0 %vm168_vm0, %v629_v53  ;;  %5729 = vmatprep.mubr.msk.f32.mxu0 %vm6525_vm1, %v6524_v56 }
 0x19a   :  { %5742 = vmatprep.subr.mxu0 %v6524_v56 }
 0x19c   :  { %5730 = vmatmul.mubr.msk.f32.vlgmr.msra.gmra.mrb[26].mxu0 %vm168_vm0, %v6808_v25 }
 0x19d   :  { %5743 = vmatpush3.xpose.msk.msra.mxu0 %vm168_vm0, %v618_v57  ;;  %5744 = vmatprep.mubr.msk.f32.mxu0 %vm6525_vm1, %v6524_v56 }
 0x19e   :  { %5747 = vmatprep.subr.mxu0 %v6524_v56 }
 0x1a0   :  { %5745 = vmatmul.mubr.msk.f32.vlgmr.msra.gmra.mrb[28].mxu0 %vm168_vm0, %v6786_v19 }
 0x1a1   :  { %5748 = vmatpush3.xpose.msk.msra.mxu0 %vm168_vm0, %v630_v59  ;;  %5749 = vmatprep.mubr.msk.f32.mxu0 %vm6525_vm1, %v6524_v56 }
 0x1a2   :  { %5762 = vmatprep.subr.mxu0 %v6524_v56 }
 0x1a4   :  { %5750 = vmatmul.mubr.msk.f32.vlgmr.msra.gmra.mrb[30].mxu0 %vm168_vm0, %v6808_v25 }
 0x1a5   :  { %5763 = vmatpush3.xpose.msk.msra.mxu0 %vm168_vm0, %v619_v63  ;;  %5764 = vmatprep.mubr.msk.f32.mxu0 %vm6525_vm1, %v6524_v56 }
 0x1a6   :  { %5767 = vmatprep.subr.mxu0 %v6524_v56 }
 0x1a8   :  { %5765 = vmatmul.mubr.msk.f32.vlgmr.msra.gmra.mrb[32].mxu0 %vm168_vm0, %v6786_v19 }
 0x1a9   :  { %5768 = vmatpush3.xpose.msk.msra.mxu0 %vm168_vm0, %v631_v1  ;;  %5769 = vmatprep.mubr.msk.f32.mxu0 %vm6525_vm1, %v6524_v56 }
 0x1aa   :  { %5782 = vmatprep.subr.mxu0 %v6524_v56 }
 0x1ac   :  { %5770 = vmatmul.mubr.msk.f32.vlgmr.msra.gmra.mrb[34].mxu0 %vm168_vm0, %v6808_v25 }
 0x1ad   :  { %5783 = vmatpush3.xpose.msk.msra.mxu0 %vm168_vm0, %v620_v4  ;;  %5784 = vmatprep.mubr.msk.f32.mxu0 %vm6525_vm1, %v6524_v56 }
 0x1ae   :  { %5787 = vmatprep.subr.mxu0 %v6524_v56 }
 0x1b0   :  { %5785 = vmatmul.mubr.msk.f32.vlgmr.msra.gmra.mrb[36].mxu0 %vm168_vm0, %v6786_v19 }
 0x1b1   :  { %5788 = vmatpush3.xpose.msk.msra.mxu0 %vm168_vm0, %v632_v6  ;;  %5789 = vmatprep.mubr.msk.f32.mxu0 %vm6525_vm1, %v6524_v56 }
 0x1b2   :  { %5802 = vmatprep.subr.mxu0 %v6524_v56 }
 0x1b4   :  { %5790 = vmatmul.mubr.msk.f32.vlgmr.msra.gmra.mrb[38].mxu0 %vm168_vm0, %v6808_v25 }
 0x1b5   :  { %5803 = vmatpush3.xpose.msk.msra.mxu0 %vm168_vm0, %v621_v10  ;;  %5804 = vmatprep.mubr.msk.f32.mxu0 %vm6525_vm1, %v6524_v56 }
 0x1b6   :  { %5807 = vmatprep.subr.mxu0 %v6524_v56 }
 0x1b8   :  { %5805 = vmatmul.mubr.msk.f32.vlgmr.msra.gmra.mrb[40].mxu0 %vm168_vm0, %v6786_v19  ;;  %v7036_v19 = vrot.slane %v455_v17, %v6763_v2 }
 0x1b9   :  { %5808 = vmatpush3.xpose.msk.msra.mxu0 %vm168_vm0, %v633_v11  ;;  %5809 = vmatprep.mubr.msk.f32.mxu0 %vm6525_vm1, %v6524_v56 }
 0x1bc   :  { %5810 = vmatmul.mubr.msk.f32.vlgmr.msra.gmra.mrb[42].mxu0 %vm168_vm0, %v6808_v25 }
 0x243   :  { %v730_v21 = vpop.f32.mrb[2].mxu1  ;;  %v1362_v22 = vpop.f32.mrb[4].mxu0 }
 0x244   :  { %v7040_v25 = vadd.f32 %v730_v21, %v7036_v19  ;;  %v5586_v26 = vpop.f32.mrb[3].mxu1  ;;  %v5626_v27 = vpop.f32.mrb[5].mxu0  ;;  %v7069_v55 = vadd.f32 %v1362_v22, %v7036_v19 }
 0x246   :  { %v811_v29 = vsel %vm810_vm2, %v7040_v25, -inf  ;;  %v1439_v1 = vsel %vm810_vm2, %v7069_v55, -inf }
 0x247   :  { %v1435_v30 = vpop.f32.mrb[6].mxu0  ;;  %812 = vmax.xlane.f32.xlu1 %v811_v29  ;;  %v806_v31 = vpop.f32.mrb[4].mxu1 }
 0x248   :  { %v7048_v33 = vadd.f32 %v806_v31, %v7043_v28  ;;  %v5591_v62 = vpop.f32.mrb[5].mxu1  ;;  %v5631_v34 = vpop.f32.mrb[7].mxu0  ;;  %v7051_v35 = vadd.f32 %v1435_v30, %v7043_v28 }
 0x24a   :  { %v814_v36 = vsel %vm810_vm2, %v7048_v33, -inf  ;;  %v1442_v44 = vsel %vm810_vm2, %v7051_v35, -inf }
 0x24b   :  { %v1678_v37 = vpop.f32.mrb[8].mxu0  ;;  %815 = vmax.xlane.f32.xlu1 %v814_v36  ;;  %v902_v39 = vpop.f32.mrb[6].mxu1 }
 0x24c   :  { %v7056_v41 = vadd.f32 %v902_v39, %v7036_v19  ;;  %v5596_v42 = vpop.f32.mrb[7].mxu1  ;;  %v5646_v43 = vpop.f32.mrb[9].mxu0  ;;  %v7076_v0 = vadd.f32 %v1678_v37, %v7036_v19 }
 0x24e   :  { %v979_v46 = vsel %vm810_vm2, %v7056_v41, -inf  ;;  %v1755_v13 = vsel %vm810_vm2, %v7076_v0, -inf }
 0x24f   :  { %v1751_v47 = vpop.f32.mrb[10].mxu0  ;;  %1443 = vmax.xlane.f32.xlu1 %v1442_v44  ;;  %980 = vmax.xlane.f32.xlu0 %v979_v46  ;;  %v975_v48 = vpop.f32.mrb[8].mxu1 }
 0x250   :  { %v7063_v50 = vadd.f32 %v1751_v47, %v7043_v28  ;;  %v7066_v51 = vadd.f32 %v975_v48, %v7043_v28  ;;  %v5601_v52 = vpop.f32.mrb[9].mxu1  ;;  %v5651_v53 = vpop.f32.mrb[11].mxu0 }
 0x252   :  { %v1758_v57 = vsel %vm810_vm2, %v7063_v50, -inf  ;;  %v982_v58 = vsel %vm810_vm2, %v7066_v51, -inf }
 0x253   :  { %v1994_v59 = vpop.f32.mrb[12].mxu0  ;;  %1759 = vmax.xlane.f32.xlu1 %v1758_v57  ;;  %983 = vmax.xlane.f32.xlu0 %v982_v58 }
 0x254   :  { %v5666_v63 = vpop.f32.mrb[13].mxu0  ;;  %v7084_v10 = vadd.f32 %v1994_v59, %v7036_v19 }
 0x256   :  { %v2071_v17 = vsel %vm810_vm2, %v7084_v10, -inf }
 0x257   :  { %v2067_v4 = vpop.f32.mrb[14].mxu0  ;;  %1440 = vmax.xlane.f32.xlu0 %v1439_v1 }
 0x258   :  { %v7081_v5 = vadd.f32 %v2067_v4, %v7043_v28  ;;  %v5671_v6 = vpop.f32.mrb[15].mxu0 }
 0x25a   :  { %v2074_v11 = vsel %vm810_vm2, %v7081_v5, -inf }
 0x25b   :  { %v2310_v14 = vpop.f32.mrb[16].mxu0  ;;  %2075 = vmax.xlane.f32.xlu1 %v2074_v11  ;;  %1756 = vmax.xlane.f32.xlu0 %v1755_v13 }
 0x25c   :  { %v5686_v15 = vpop.f32.mrb[17].mxu0  ;;  %v7091_v16 = vadd.f32 %v2310_v14, %v7036_v19 }
 0x25e   :  { %v2387_v26 = vsel %vm810_vm2, %v7091_v16, -inf }
 0x25f   :  { %v2383_v18 = vpop.f32.mrb[18].mxu0  ;;  %2072 = vmax.xlane.f32.xlu0 %v2071_v17 }
 0x260   :  { %v7096_v20 = vadd.f32 %v2383_v18, %v7043_v28  ;;  %v5691_v21 = vpop.f32.mrb[19].mxu0 }
 0x262   :  { %v2390_v22 = vsel %vm810_vm2, %v7096_v20, -inf }
 0x263   :  { %v2626_v27 = vpop.f32.mrb[20].mxu0  ;;  %2391 = vmax.xlane.f32.xlu1 %v2390_v22  ;;  %2388 = vmax.xlane.f32.xlu0 %v2387_v26 }
 0x264   :  { %v7103_v29 = vadd.f32 %v2626_v27, %v7036_v19  ;;  %v5706_v30 = vpop.f32.mrb[21].mxu0 }
 0x266   :  { %v2703_v31 = vsel %vm810_vm2, %v7103_v29, -inf }
 0x267   :  { %v2699_v62 = vpop.f32.mrb[22].mxu0  ;;  %2704 = vmax.xlane.f32.xlu0 %v2703_v31 }
 0x268   :  { %v7108_v34 = vadd.f32 %v2699_v62, %v7043_v28  ;;  %v5711_v36 = vpop.f32.mrb[23].mxu0 }
 0x26a   :  { %v2706_v37 = vsel %vm810_vm2, %v7108_v34, -inf }
 0x26b   :  { %v2942_v39 = vpop.f32.mrb[24].mxu0  ;;  %2707 = vmax.xlane.f32.xlu1 %v2706_v37 }
 0x26c   :  { %v7113_v42 = vadd.f32 %v2942_v39, %v7036_v19  ;;  %v5726_v43 = vpop.f32.mrb[25].mxu0 }
 0x26e   :  { %v3019_v44 = vsel %vm810_vm2, %v7113_v42, -inf }
 0x26f   :  { %v3015_v46 = vpop.f32.mrb[26].mxu0  ;;  %3020 = vmax.xlane.f32.xlu0 %v3019_v44 }
 0x270   :  { %v7118_v47 = vadd.f32 %v3015_v46, %v7043_v28  ;;  %v5731_v48 = vpop.f32.mrb[27].mxu0 }
 0x272   :  { %v3022_v52 = vsel %vm810_vm2, %v7118_v47, -inf }
 0x273   :  { %v3258_v53 = vpop.f32.mrb[28].mxu0  ;;  %3023 = vmax.xlane.f32.xlu1 %v3022_v52 }
 0x274   :  { %v7123_v57 = vadd.f32 %v3258_v53, %v7036_v19  ;;  %v5746_v58 = vpop.f32.mrb[29].mxu0 }
 0x276   :  { %v3335_v59 = vsel %vm810_vm2, %v7123_v57, -inf }
 0x277   :  { %v3331_v63 = vpop.f32.mrb[30].mxu0  ;;  %3336 = vmax.xlane.f32.xlu0 %v3335_v59 }
 0x278   :  { %v7128_v1 = vadd.f32 %v3331_v63, %v7043_v28  ;;  %v5751_v4 = vpop.f32.mrb[31].mxu0 }
 0x27a   :  { %v3338_v6 = vsel %vm810_vm2, %v7128_v1, -inf }
 0x27b   :  { %v3574_v11 = vpop.f32.mrb[32].mxu0  ;;  %3339 = vmax.xlane.f32.xlu1 %v3338_v6 }
 0x27c   :  { %v7133_v13 = vadd.f32 %v3574_v11, %v7036_v19  ;;  %v5766_v14 = vpop.f32.mrb[33].mxu0 }
 0x27e   :  { %v3651_v15 = vsel %vm810_vm2, %v7133_v13, -inf }
 0x27f   :  { %v3647_v17 = vpop.f32.mrb[34].mxu0  ;;  %3652 = vmax.xlane.f32.xlu0 %v3651_v15 }
 0x280   :  { %v7138_v18 = vadd.f32 %v3647_v17, %v7043_v28  ;;  %v5771_v21 = vpop.f32.mrb[35].mxu0 }
 0x282   :  { %v3654_v22 = vsel %vm810_vm2, %v7138_v18, -inf }
 0x283   :  { %v3890_v26 = vpop.f32.mrb[36].mxu0  ;;  %3655 = vmax.xlane.f32.xlu1 %v3654_v22 }
 0x284   :  { %v7143_v27 = vadd.f32 %v3890_v26, %v7036_v19  ;;  %v5786_v30 = vpop.f32.mrb[37].mxu0 }
 0x286   :  { %v3967_v31 = vsel %vm810_vm2, %v7143_v27, -inf }
 0x287   :  { %v3963_v62 = vpop.f32.mrb[38].mxu0  ;;  %3968 = vmax.xlane.f32.xlu0 %v3967_v31 }
 0x288   :  { %v7148_v36 = vadd.f32 %v3963_v62, %v7043_v28  ;;  %v5791_v37 = vpop.f32.mrb[39].mxu0 }
 0x28a   :  { %v3970_v39 = vsel %vm810_vm2, %v7148_v36, -inf }
 0x28b   :  { %v4206_v43 = vpop.f32.mrb[40].mxu0  ;;  %3971 = vmax.xlane.f32.xlu1 %v3970_v39 }
 0x28c   :  { %v7153_v44 = vadd.f32 %v4206_v43, %v7036_v19  ;;  %v5806_v46 = vpop.f32.mrb[41].mxu0 }
 0x28e   :  { %v4283_v48 = vsel %vm810_vm2, %v7153_v44, -inf }
 0x28f   :  { %v4279_v52 = vpop.f32.mrb[42].mxu0  ;;  %4284 = vmax.xlane.f32.xlu1 %v4283_v48 }
 0x290   :  { %v7158_v53 = vadd.f32 %v4279_v52, %v7043_v28  ;;  %v5811_v58 = vpop.f32.mrb[43].mxu0 }
 0x292   :  { %v4286_v59 = vsel %vm810_vm2, %v7158_v53, -inf }
 0x293   :  { %4287 = vmax.xlane.f32.xlu1 %v4286_v59 }
 0x2d4   :  { %v813_v63 = vpop.xlane.xlu1 %812 }
 0x2d5   :  { %v817_v22 = vsub.f32 %v7040_v25, %v813_v63 }
 0x2d7   :  { %v819_v39 = vmul.f32 1.442695, %v817_v22 }
 0x2d8   :  { %v816_v4 = vpop.xlane.xlu1 %815 }
 0x2d9   :  { %v818_v6 = vsub.f32 %v7048_v33, %v816_v4 }
 0x2db   :  { %v821_v19 = vmul.f32 1.442695, %v818_v6 }
 0x2dc   :  { %v1444_v11 = vpop.xlane.xlu1 %1443  ;;  %v981_v14 = vpop.xlane.xlu0 %980 }
 0x2dd   :  { %6268 = vpow2.f32 %v821_v19  ;;  %v1446_v15 = vsub.f32 %v7051_v35, %v1444_v11  ;;  %v985_v17 = vsub.f32 %v7056_v41, %v981_v14 }
 0x2df   :  { %v1449_v21 = vmul.f32 1.442695, %v1446_v15  ;;  %v987_v28 = vmul.f32 1.442695, %v985_v17 }
 0x2e0   :  { %v1760_v26 = vpop.xlane.xlu1 %1759  ;;  %v984_v30 = vpop.xlane.xlu0 %983 }
 0x2e1   :  { %6270 = vpow2.f32 %v1449_v21  ;;  %v1762_v31 = vsub.f32 %v7063_v50, %v1760_v26  ;;  %v986_v62 = vsub.f32 %v7066_v51, %v984_v30 }
 0x2e2   :  { %6272 = vpow2.f32 %v987_v28 }
 0x2e3   :  { %v1765_v33 = vmul.f32 1.442695, %v1762_v31  ;;  %v989_v37 = vmul.f32 1.442695, %v986_v62 }
 0x2e4   :  { %v1441_v43 = vpop.xlane.xlu0 %1440 }
 0x2e5   :  { %6274 = vpow2.f32 %v1765_v33  ;;  %v1445_v35 = vsub.f32 %v7069_v55, %v1441_v43 }
 0x2e6   :  { %6276 = vpow2.f32 %v989_v37 }
 0x2e7   :  { %v7169_v41 = vpop.eup %6268  ;;  %6278 = vpow2.f32 %v819_v39  ;;  %v1447_v25 = vmul.f32 1.442695, %v1445_v35 }
 0x2e8   :  { %v2076_v46 = vpop.xlane.xlu1 %2075  ;;  %v1757_v48 = vpop.xlane.xlu0 %1756  ;;  %v826_v50 = vsel %vm810_vm2, %v7169_v41, 0.0 }
 0x2e9   :  { %v2078_v51 = vsub.f32 %v7081_v5, %v2076_v46  ;;  %v1761_v52 = vsub.f32 %v7076_v0, %v1757_v48  ;;  %827 = vadd.xlane.f32.xlu1 %v826_v50  ;;  %6280 = vpow2.f32 %v1447_v25 }
 0x2eb   :  { %v7175_v58 = vpop.eup %6270  ;;  %v2081_v59 = vmul.f32 1.442695, %v2078_v51  ;;  %v1763_v55 = vmul.f32 1.442695, %v1761_v52 }
 0x2ec   :  { %v7177_v63 = vpop.eup %6272  ;;  %v2073_v4 = vpop.xlane.xlu0 %2072  ;;  %v1454_v6 = vsel %vm810_vm2, %v7175_v58, 0.0 }
 0x2ed   :  { %6282 = vpow2.f32 %v2081_v59  ;;  %v2077_v19 = vsub.f32 %v7084_v10, %v2073_v4  ;;  %1455 = vadd.xlane.f32.xlu1 %v1454_v6  ;;  %v991_v5 = vsel %vm810_vm2, %v7177_v63, 0.0 }
 0x2ee   :  { %992 = vadd.xlane.f32.xlu0 %v991_v5  ;;  %6284 = vpow2.f32 %v1763_v55 }
 0x2ef   :  { %v7184_v0 = vpop.eup %6274  ;;  %v2079_v14 = vmul.f32 1.442695, %v2077_v19 }
 0x2f0   :  { %v7186_v11 = vpop.eup %6276  ;;  %v2392_v15 = vpop.xlane.xlu1 %2391  ;;  %v1770_v21 = vsel %vm810_vm2, %v7184_v0, 0.0 }
 0x2f1   :  { %v2389_v17 = vpop.xlane.xlu0 %2388  ;;  %v2394_v28 = vsub.f32 %v7096_v20, %v2392_v15  ;;  %1771 = vadd.xlane.f32.xlu1 %v1770_v21  ;;  %v994_v22 = vsel %vm810_vm2, %v7186_v11, 0.0  ;;  %v7194_v26 = vpop.eup %6278  ;;  %6286 = vpow2.f32 %v2079_v14 }
 0x2f2   :  { %v2393_v10 = vsub.f32 %v7091_v16, %v2389_v17  ;;  %995 = vadd.xlane.f32.xlu0 %v994_v22  ;;  %v823_v37 = vsel %vm810_vm2, %v7194_v26, 0.0 }
 0x2f3   :  { %v2397_v30 = vmul.f32 1.442695, %v2394_v28  ;;  %v7199_v20 = vpop.eup %6280 }
 0x2f4   :  { %v2395_v31 = vmul.f32 1.442695, %v2393_v10 }
 0x2f5   :  { %v2705_v62 = vpop.xlane.xlu0 %2704  ;;  %6288 = vpow2.f32 %v2397_v30 }
 0x2f6   :  { %v2709_v33 = vsub.f32 %v7103_v29, %v2705_v62  ;;  %824 = vadd.xlane.f32.xlu0 %v823_v37  ;;  %6290 = vpow2.f32 %v2395_v31  ;;  %v1451_v29 = vsel %vm810_vm2, %v7199_v20, 0.0 }
 0x2f7   :  { %v7201_v16 = vpop.eup %6282 }
 0x2f8   :  { %v2711_v39 = vmul.f32 1.442695, %v2709_v33  ;;  %v2708_v43 = vpop.xlane.xlu1 %2707  ;;  %v2086_v35 = vsel %vm810_vm2, %v7201_v16, 0.0  ;;  %v7208_v46 = vpop.eup %6284 }
 0x2f9   :  { %v2710_v25 = vsub.f32 %v7108_v34, %v2708_v43  ;;  %2087 = vadd.xlane.f32.xlu1 %v2086_v35  ;;  %v1767_v52 = vsel %vm810_vm2, %v7208_v46, 0.0 }
 0x2fa   :  { %1452 = vadd.xlane.f32.xlu0 %v1451_v29  ;;  %6292 = vpow2.f32 %v2711_v39 }
 0x2fb   :  { %v2713_v48 = vmul.f32 1.442695, %v2710_v25  ;;  %v7213_v59 = vpop.eup %6286 }
 0x2fc   :  { %v3021_v50 = vpop.xlane.xlu0 %3020 }
 0x2fd   :  { %6294 = vpow2.f32 %v2713_v48  ;;  %v3025_v51 = vsub.f32 %v7113_v42, %v3021_v50  ;;  %v2083_v42 = vsel %vm810_vm2, %v7213_v59, 0.0 }
 0x2fe   :  { %1768 = vadd.xlane.f32.xlu0 %v1767_v52 }
 0x2ff   :  { %v7215_v34 = vpop.eup %6288  ;;  %v3027_v55 = vmul.f32 1.442695, %v3025_v51 }
 0x300   :  { %v3024_v4 = vpop.xlane.xlu1 %3023  ;;  %v2402_v6 = vsel %vm810_vm2, %v7215_v34, 0.0  ;;  %v7222_v5 = vpop.eup %6290 }
 0x301   :  { %6296 = vpow2.f32 %v3027_v55  ;;  %v3026_v19 = vsub.f32 %v7118_v47, %v3024_v4  ;;  %2403 = vadd.xlane.f32.xlu1 %v2402_v6  ;;  %v2399_v21 = vsel %vm810_vm2, %v7222_v5, 0.0 }
 0x302   :  { %2084 = vadd.xlane.f32.xlu0 %v2083_v42 }
 0x303   :  { %v3029_v14 = vmul.f32 1.442695, %v3026_v19 }
 0x304   :  { %v3337_v15 = vpop.xlane.xlu0 %3336  ;;  %v7227_v28 = vpop.eup %6292 }
 0x305   :  { %6298 = vpow2.f32 %v3029_v14  ;;  %v3341_v17 = vsub.f32 %v7123_v57, %v3337_v15  ;;  %v2715_v57 = vsel %vm810_vm2, %v7227_v28, 0.0 }
 0x306   :  { %2400 = vadd.xlane.f32.xlu0 %v2399_v21 }
 0x307   :  { %v7229_v10 = vpop.eup %6294  ;;  %v3343_v47 = vmul.f32 1.442695, %v3341_v17 }
 0x308   :  { %v3340_v22 = vpop.xlane.xlu1 %3339  ;;  %v2718_v30 = vsel %vm810_vm2, %v7229_v10, 0.0 }
 0x309   :  { %6300 = vpow2.f32 %v3343_v47  ;;  %v3342_v31 = vsub.f32 %v7128_v1, %v3340_v22  ;;  %2719 = vadd.xlane.f32.xlu1 %v2718_v30 }
 0x30a   :  { %2716 = vadd.xlane.f32.xlu0 %v2715_v57 }
 0x30b   :  { %v7236_v62 = vpop.eup %6296  ;;  %v3345_v33 = vmul.f32 1.442695, %v3342_v31 }
 0x30c   :  { %v3653_v37 = vpop.xlane.xlu0 %3652  ;;  %v3031_v39 = vsel %vm810_vm2, %v7236_v62, 0.0 }
 0x30d   :  { %6302 = vpow2.f32 %v3345_v33  ;;  %v3657_v43 = vsub.f32 %v7133_v13, %v3653_v37 }
 0x30e   :  { %3032 = vadd.xlane.f32.xlu0 %v3031_v39 }
 0x30f   :  { %v7241_v35 = vpop.eup %6298  ;;  %v3659_v25 = vmul.f32 1.442695, %v3657_v43 }
 0x310   :  { %v3656_v1 = vpop.xlane.xlu1 %3655  ;;  %v3034_v29 = vsel %vm810_vm2, %v7241_v35, 0.0 }
 0x311   :  { %6304 = vpow2.f32 %v3659_v25  ;;  %v3658_v48 = vsub.f32 %v7138_v18, %v3656_v1  ;;  %3035 = vadd.xlane.f32.xlu1 %v3034_v29  ;;  %v4453_v29 = vld [vmem:[#allocation7] sm:$0xff] }
 0x313   :  { %v7246_v50 = vpop.eup %6300  ;;  %v3661_v51 = vmul.f32 1.442695, %v3658_v48  ;;  %v4454_v48 = vld [vmem:[#allocation7 + $0x8] sm:$0xff] }
 0x314   :  { %v3969_v52 = vpop.xlane.xlu0 %3968  ;;  %v3347_v55 = vsel %vm810_vm2, %v7246_v50, 0.0 }
 0x315   :  { %6306 = vpow2.f32 %v3661_v51  ;;  %v3973_v13 = vsub.f32 %v7143_v27, %v3969_v52  ;;  %3348 = vadd.xlane.f32.xlu0 %v3347_v55  ;;  %v4455_v51 = vld [vmem:[#allocation7 + $0x10] sm:$0xff]  ;;  %v6029_v52 = vpack.c.bf16 %v4454_v48, %v4453_v29  ;;  %v4456_v55 = vld [vmem:[#allocation7 + $0x18] sm:$0xff] }
 0x317   :  { %v7251_v4 = vpop.eup %6302  ;;  %v3975_v6 = vmul.f32 1.442695, %v3973_v13  ;;  %v6033_v13 = vpack.c.bf16 %v4456_v55, %v4455_v51  ;;  %6030 = vmatprep.subr.bf16.mxu0 %v6029_v52 }
 0x318   :  { %v3972_v19 = vpop.xlane.xlu1 %3971  ;;  %v3350_v42 = vsel %vm810_vm2, %v7251_v4, 0.0  ;;  %6032 = vmatpush3.bf16.msra.mxu0 %v6029_v52 }
 0x319   :  { %6308 = vpow2.f32 %v3975_v6  ;;  %v3974_v18 = vsub.f32 %v7148_v36, %v3972_v19  ;;  %3351 = vadd.xlane.f32.xlu1 %v3350_v42  ;;  %v4457_v6 = vld [vmem:[#allocation7 + $0x20] sm:$0xff]  ;;  %v4458_v19 = vld [vmem:[#allocation7 + $0x28] sm:$0xff]  ;;  %6034 = vmatprep.subr.bf16.mxu0 %v6033_v13 }
 0x31a   :  { %v6037_v42 = vpack.c.bf16 %v4458_v19, %v4457_v6 }
 0x31b   :  { %v7256_v14 = vpop.eup %6304  ;;  %v3977_v15 = vmul.f32 1.442695, %v3974_v18  ;;  %v4459_v18 = vld [vmem:[#allocation7 + $0x30] sm:$0xff] }
 0x31c   :  { %v4285_v17 = vpop.xlane.xlu1 %4284  ;;  %v3663_v21 = vsel %vm810_vm2, %v7256_v14, 0.0  ;;  %6036 = vmatpush3.bf16.msra.mxu0 %v6033_v13 }
 0x31d   :  { %6310 = vpow2.f32 %v3977_v15  ;;  %v4289_v27 = vsub.f32 %v7153_v44, %v4285_v17  ;;  %3664 = vadd.xlane.f32.xlu0 %v3663_v21  ;;  %v4460_v15 = vld [vmem:[#allocation7 + $0x38] sm:$0xff]  ;;  %6038 = vmatprep.subr.bf16.mxu0 %v6037_v42  ;;  %v4461_v21 = vld [vmem:[#allocation7 + $0x40] sm:$0xff] }
 0x31e   :  { %v6041_v17 = vpack.c.bf16 %v4460_v15, %v4459_v18  ;;  %v648_v15 = vmul.f32 %v6772_v8, %v6882_v40 }
 0x31f   :  { %v7261_v47 = vpop.eup %6306  ;;  %v4291_v22 = vmul.f32 1.442695, %v4289_v27  ;;  %v4462_v27 = vld [vmem:[#allocation7 + $0x48] sm:$0xff] }
 0x320   :  { %v4288_v30 = vpop.xlane.xlu1 %4287  ;;  %v3666_v31 = vsel %vm810_vm2, %v7261_v47, 0.0  ;;  %6040 = vmatpush3.bf16.msra.mxu0 %v6037_v42  ;;  %v636_v42 = vmul.f32 %v6772_v8, %v7025_v12 }
 0x321   :  { %6312 = vpow2.f32 %v4291_v22  ;;  %v4290_v36 = vsub.f32 %v7158_v53, %v4288_v30  ;;  %3667 = vadd.xlane.f32.xlu1 %v3666_v31  ;;  %6042 = vmatprep.subr.bf16.mxu0 %v6041_v17  ;;  %v6045_v22 = vpack.c.bf16 %v4462_v27, %v4461_v21  ;;  %v637_v27 = vmul.f32 %v6800_v24, %v7025_v12 }
 0x323   :  { %v7266_v57 = vpop.eup %6308  ;;  %v4293_v33 = vmul.f32 1.442695, %v4290_v36 }
 0x324   :  { %v3979_v37 = vsel %vm810_vm2, %v7266_v57, 0.0  ;;  %6044 = vmatpush3.bf16.msra.mxu0 %v6041_v17 }
 0x325   :  { %6314 = vpow2.f32 %v4293_v33  ;;  %3980 = vadd.xlane.f32.xlu0 %v3979_v37  ;;  %6046 = vmatprep.subr.bf16.mxu0 %v6045_v22 }
 0x327   :  { %v7270_v44 = vpop.eup %6310 }
 0x328   :  { %v3982_v39 = vsel %vm810_vm2, %v7270_v44, 0.0  ;;  %6048 = vmatpush3.bf16.msra.mxu0 %v6045_v22 }
 0x329   :  { %3983 = vadd.xlane.f32.xlu1 %v3982_v39 }
 0x32b   :  { %v7274_v43 = vpop.eup %6312 }
 0x32c   :  { %v4295_v53 = vsel %vm810_vm2, %v7274_v43, 0.0 }
 0x32d   :  { %4296 = vadd.xlane.f32.xlu0 %v4295_v53 }
 0x32f   :  { %v7278_v25 = vpop.eup %6314 }
 0x330   :  { %v4298_v1 = vsel %vm810_vm2, %v7278_v25, 0.0 }
 0x331   :  { %4299 = vadd.xlane.f32.xlu1 %v4298_v1  ;;  %v647_v1 = vmul.f32 %v6797_v23, %v6882_v40 }
 0x376   :  { %v828_v36 = vpop.xlane.xlu1 %827 }
 0x37a   :  { %v1456_v48 = vpop.xlane.xlu1 %1455 }
 0x37b   :  { %v993_v30 = vpop.xlane.xlu0 %992 }
 0x37c   :  { %6316 = vrcp.f32 %v993_v30  ;;  %v649_v30 = vmul.f32 %v6800_v24, %v6882_v40 }
 0x37e   :  { %v1772_v19 = vpop.xlane.xlu1 %1771 }
 0x37f   :  { %v996_v31 = vpop.xlane.xlu0 %995 }
 0x380   :  { %6318 = vrcp.f32 %v996_v31 }
 0x383   :  { %v825_v33 = vpop.xlane.xlu0 %824 }
 0x384   :  { %6320 = vrcp.f32 %v825_v33  ;;  %v638_v33 = vmul.f32 %v6839_v32, %v7025_v12 }
 0x385   :  { %6322 = vrcp.f32 %v828_v36 }
 0x386   :  { %v6317_v37 = vpop.eup %6316  ;;  %v2088_v21 = vpop.xlane.xlu1 %2087 }
 0x387   :  { %v999_v39 = vmul.f32 %v6317_v37, %v7177_v63  ;;  %v1453_v53 = vpop.xlane.xlu0 %1452  ;;  %v634_v63 = vmul.f32 %v6769_v7, %v7025_v12 }
 0x388   :  { %6324 = vrcp.f32 %v1453_v53 }
 0x389   :  { %5605 = vmatmul.mubr.msk.f32.vlgmr.msra.gmra.mrb[10].mxu1 %vm810_vm2, %v999_v39  ;;  %6326 = vrcp.f32 %v1456_v48  ;;  %v650_v39 = vmul.f32 %v6839_v32, %v6882_v40 }
 0x38a   :  { %v6319_v29 = vpop.eup %6318  ;;  %5608 = vmatpush3.msra.mxu1 %v647_v1  ;;  %5609 = vmatprep.mubr.msk.f32.mxu1 %vm6525_vm1, %v6524_v56 }
 0x38b   :  { %v1000_v51 = vmul.f32 %v6319_v29, %v7186_v11  ;;  %5612 = vmatprep.subr.mxu1 %v6524_v56  ;;  %v1769_v55 = vpop.xlane.xlu0 %1768  ;;  %v646_v11 = vmul.f32 %v6769_v7, %v6882_v40  ;;  %v639_v29 = vmul.f32 %v6874_v38, %v7025_v12 }
 0x38c   :  { %6328 = vrcp.f32 %v1769_v55 }
 0x38d   :  { %5610 = vmatmul.mubr.msk.f32.vlgmr.msra.gmra.mrb[12].mxu1 %vm810_vm2, %v1000_v51  ;;  %6330 = vrcp.f32 %v1772_v19  ;;  %v651_v51 = vmul.f32 %v6874_v38, %v6882_v40  ;;  %v641_v19 = vmul.f32 %v6917_v49, %v7025_v12 }
 0x38e   :  { %v6321_v52 = vpop.eup %6320  ;;  %5613 = vmatpush3.msra.mxu1 %v634_v63  ;;  %5614 = vmatprep.mubr.msk.f32.mxu1 %vm6525_vm1, %v6524_v56  ;;  %v2404_v36 = vpop.xlane.xlu1 %2403 }
 0x38f   :  { %v831_v23 = vmul.f32 %v6321_v52, %v7194_v26  ;;  %5617 = vmatprep.subr.mxu1 %v6524_v56  ;;  %v6323_v13 = vpop.eup %6322  ;;  %v2085_v18 = vpop.xlane.xlu0 %2084 }
 0x390   :  { %v832_v6 = vmul.f32 %v6323_v13, %v7169_v41  ;;  %6332 = vrcp.f32 %v2085_v18  ;;  %v652_v13 = vmul.f32 %v6898_v45, %v6882_v40 }
 0x391   :  { %5615 = vmatmul.mubr.msk.f32.vlgmr.msra.gmra.mrb[10].mxu1 %vm810_vm2, %v831_v23  ;;  %6334 = vrcp.f32 %v2088_v21  ;;  %v640_v23 = vmul.f32 %v6898_v45, %v7025_v12 }
 0x392   :  { %5618 = vmatpush3.msra.mxu1 %v646_v11  ;;  %5619 = vmatprep.mubr.msk.f32.mxu1 %vm6525_vm1, %v6524_v56  ;;  %v6325_v26 = vpop.eup %6324 }
 0x393   :  { %5632 = vmatprep.subr.mxu1 %v6524_v56  ;;  %v1459_v7 = vmul.f32 %v6325_v26, %v7199_v20  ;;  %v6327_v41 = vpop.eup %6326  ;;  %v2401_v22 = vpop.xlane.xlu0 %2400 }
 0x394   :  { %v1460_v17 = vmul.f32 %v6327_v41, %v7175_v58  ;;  %6336 = vrcp.f32 %v2401_v22  ;;  %v642_v41 = vmul.f32 %v6940_v54, %v7025_v12  ;;  %v655_v22 = vmul.f32 %v6960_v60, %v6882_v40 }
 0x395   :  { %5620 = vmatmul.mubr.msk.f32.vlgmr.msra.gmra.mrb[12].mxu1 %vm810_vm2, %v832_v6  ;;  %6338 = vrcp.f32 %v2404_v36 }
 0x396   :  { %5633 = vmatpush3.msra.mxu1 %v636_v42  ;;  %5634 = vmatprep.mubr.msk.f32.mxu1 %vm6525_vm1, %v6524_v56  ;;  %v6329_v20 = vpop.eup %6328  ;;  %v2720_v1 = vpop.xlane.xlu1 %2719  ;;  %v653_v42 = vmul.f32 %v6917_v49, %v6882_v40 }
 0x397   :  { %5637 = vmatprep.subr.mxu1 %v6524_v56  ;;  %v1775_v8 = vmul.f32 %v6329_v20, %v7208_v46  ;;  %v6331_v58 = vpop.eup %6330  ;;  %v2717_v37 = vpop.xlane.xlu0 %2716 }
 0x398   :  { %v1776_v31 = vmul.f32 %v6331_v58, %v7184_v0  ;;  %6340 = vrcp.f32 %v2717_v37  ;;  %v4463_v37 = vld [vmem:[#allocation7 + $0x50] sm:$0xff] }
 0x399   :  { %5635 = vmatmul.mubr.msk.f32.vlgmr.msra.gmra.mrb[10].mxu1 %vm810_vm2, %v1459_v7  ;;  %6342 = vrcp.f32 %v2720_v1 }
 0x39a   :  { %5638 = vmatpush3.msra.mxu1 %v648_v15  ;;  %5639 = vmatprep.mubr.msk.f32.mxu1 %vm6525_vm1, %v6524_v56  ;;  %v6333_v46 = vpop.eup %6332 }
 0x39b   :  { %5652 = vmatprep.subr.mxu1 %v6524_v56  ;;  %v2091_v24 = vmul.f32 %v6333_v46, %v7213_v59  ;;  %v6335_v0 = vpop.eup %6334  ;;  %v3033_v48 = vpop.xlane.xlu0 %3032 }
 0x39c   :  { %v2092_v53 = vmul.f32 %v6335_v0, %v7201_v16  ;;  %6344 = vrcp.f32 %v3033_v48  ;;  %v4464_v0 = vld [vmem:[#allocation7 + $0x58] sm:$0xff]  ;;  %v4559_v48 = vld [vmem:[%s7649_s20 + $0x30] sm:$0xff] }
 0x39d   :  { %5640 = vmatmul.mubr.msk.f32.vlgmr.msra.gmra.mrb[12].mxu1 %vm810_vm2, %v1460_v17  ;;  %v654_v17 = vmul.f32 %v6940_v54, %v6882_v40 }
 0x39e   :  { %5653 = vmatpush3.msra.mxu1 %v637_v27  ;;  %5654 = vmatprep.mubr.msk.f32.mxu1 %vm6525_vm1, %v6524_v56  ;;  %v6337_v59 = vpop.eup %6336  ;;  %v3036_v52 = vpop.xlane.xlu1 %3035  ;;  %v643_v27 = vmul.f32 %v6960_v60, %v7025_v12 }
 0x39f   :  { %5657 = vmatprep.subr.mxu1 %v6524_v56  ;;  %v2407_v32 = vmul.f32 %v6337_v59, %v7222_v5  ;;  %v6339_v16 = vpop.eup %6338  ;;  %6346 = vrcp.f32 %v3036_v52  ;;  %v4557_v59 = vld [vmem:[%s7649_s20 + $0x20] sm:$0xff]  ;;  %v4562_v52 = vld [vmem:[%s7649_s20 + $0x48] sm:$0xff] }
 0x3a0   :  { %v2408_v63 = vmul.f32 %v6339_v16, %v7215_v34  ;;  %v4560_v16 = vld [vmem:[%s7649_s20 + $0x38] sm:$0xff] }
 0x3a1   :  { %5655 = vmatmul.mubr.msk.f32.vlgmr.msra.gmra.mrb[10].mxu1 %vm810_vm2, %v1775_v8 }
 0x3a2   :  { %5658 = vmatpush3.msra.mxu1 %v649_v30  ;;  %5659 = vmatprep.mubr.msk.f32.mxu1 %vm6525_vm1, %v6524_v56  ;;  %v6341_v5 = vpop.eup %6340  ;;  %v3349_v55 = vpop.xlane.xlu0 %3348 }
 0x3a3   :  { %5672 = vmatprep.subr.mxu1 %v6524_v56  ;;  %v2723_v38 = vmul.f32 %v6341_v5, %v7227_v28  ;;  %v6343_v34 = vpop.eup %6342  ;;  %6348 = vrcp.f32 %v3349_v55 }
 0x3a4   :  { %v2724_v11 = vmul.f32 %v6343_v34, %v7229_v10 }
 0x3a5   :  { %5660 = vmatmul.mubr.msk.f32.vlgmr.msra.gmra.mrb[12].mxu1 %vm810_vm2, %v1776_v31  ;;  %v644_v31 = vmul.f32 %v6979_v3, %v7025_v12 }
 0x3a6   :  { %5673 = vmatpush3.msra.mxu1 %v638_v33  ;;  %5674 = vmatprep.mubr.msk.f32.mxu1 %vm6525_vm1, %v6524_v56  ;;  %v3352_v6 = vpop.xlane.xlu1 %3351  ;;  %v6345_v28 = vpop.eup %6344 }
 0x3a7   :  { %5677 = vmatprep.subr.mxu1 %v6524_v56  ;;  %6350 = vrcp.f32 %v3352_v6  ;;  %v3039_v45 = vmul.f32 %v6345_v28, %v7236_v62  ;;  %v5273_v28 = vld [vmem:[%s7624_s11] ss:$0 sm:$0xff] }
 0x3a9   :  { %5675 = vmatmul.mubr.msk.f32.vlgmr.msra.gmra.mrb[10].mxu1 %vm810_vm2, %v2091_v24  ;;  %v6347_v10 = vpop.eup %6346 }
 0x3aa   :  { %5678 = vmatpush3.msra.mxu1 %v650_v39  ;;  %5679 = vmatprep.mubr.msk.f32.mxu1 %vm6525_vm1, %v6524_v56  ;;  %v3665_v26 = vpop.xlane.xlu0 %3664  ;;  %v3040_v7 = vmul.f32 %v6347_v10, %v7241_v35  ;;  %v6049_v39 = vpack.c.bf16 %v4464_v0, %v4463_v37  ;;  %v4767_v37 = vld [vmem:[#allocation9 + $0x60] sm:$0xff]  ;;  %v4769_v0 = vld [vmem:[#allocation9 + $0x70] sm:$0xff] }
 0x3ab   :  { %5692 = vmatprep.subr.mxu1 %v6524_v56  ;;  %6352 = vrcp.f32 %v3665_v26 }
 0x3ac   :  { %6050 = vmatprep.subr.bf16.mxu0 %v6049_v39 }
 0x3ad   :  { %5680 = vmatmul.mubr.msk.f32.vlgmr.msra.gmra.mrb[12].mxu1 %vm810_vm2, %v2092_v53  ;;  %v6349_v62 = vpop.eup %6348  ;;  %6052 = vmatpush3.bf16.msra.mxu0 %v6049_v39  ;;  %v4556_v53 = vld [vmem:[%s7649_s20 + $0x18] sm:$0xff]  ;;  %v6115_v39 = vpack.c.bf16 %v4769_v0, %v4767_v37 }
 0x3ae   :  { %5693 = vmatpush3.msra.mxu1 %v639_v29  ;;  %5694 = vmatprep.mubr.msk.f32.mxu1 %vm6525_vm1, %v6524_v56  ;;  %v3668_v18 = vpop.xlane.xlu1 %3667  ;;  %v3355_v49 = vmul.f32 %v6349_v62, %v7246_v50  ;;  %v4558_v29 = vld [vmem:[%s7649_s20 + $0x28] sm:$0xff] }
 0x3af   :  { %5697 = vmatprep.subr.mxu1 %v6524_v56  ;;  %6354 = vrcp.f32 %v3668_v18  ;;  %v6373_v18 = vld [vmem:[%s7646_s0 + $0x8] sm:$0xff] }
 0x3b1   :  { %5695 = vmatmul.mubr.msk.f32.vlgmr.msra.gmra.mrb[10].mxu1 %vm810_vm2, %v2407_v32  ;;  %v6351_v35 = vpop.eup %6350  ;;  %v7470_v32 = vpack.c.bf16 %v4558_v29, %v4557_v59  ;;  %v4773_v59 = vld [vmem:[#allocation9 + $0x90] sm:$0xff]  ;;  %v4776_v29 = vld [vmem:[#allocation9 + $0xa8] sm:$0xff] }
 0x3b2   :  { %5698 = vmatpush3.msra.mxu1 %v651_v51  ;;  %5699 = vmatprep.mubr.msk.f32.mxu1 %vm6525_vm1, %v6524_v56  ;;  %v3981_v15 = vpop.xlane.xlu0 %3980  ;;  %v3356_v21 = vmul.f32 %v6351_v35, %v7251_v4  ;;  %v7480_v51 = vpack.c.bf16 %v4560_v16, %v4559_v48  ;;  %v4778_v48 = vld [vmem:[#allocation9 + $0xb8] sm:$0xff] }
 0x3b3   :  { %5712 = vmatprep.subr.mxu1 %v6524_v56  ;;  %6356 = vrcp.f32 %v3981_v15  ;;  %v4755_v15 = vld [vmem:[#allocation9] sm:$0xff] }
 0x3b5   :  { %5700 = vmatmul.mubr.msk.f32.vlgmr.msra.gmra.mrb[12].mxu1 %vm810_vm2, %v2408_v63  ;;  %v6353_v50 = vpop.eup %6352  ;;  %v4561_v63 = vld [vmem:[%s7649_s20 + $0x40] sm:$0xff] }
 0x3b6   :  { %5713 = vmatpush3.msra.mxu1 %v640_v23  ;;  %5714 = vmatprep.mubr.msk.f32.mxu1 %vm6525_vm1, %v6524_v56  ;;  %v3984_v20 = vpop.xlane.xlu1 %3983  ;;  %v3671_v54 = vmul.f32 %v6353_v50, %v7256_v14  ;;  %v7490_v5 = vpack.c.bf16 %v4562_v52, %v4561_v63  ;;  %v6121_v63 = vpack.c.bf16 %v4778_v48, %v4776_v29  ;;  %v4775_v52 = vld [vmem:[#allocation9 + $0xa0] sm:$0xff]  ;;  %v4901_v29 = vld [vmem:[#allocation10 + $0xb8] sm:$0xff] }
 0x3b7   :  { %5717 = vmatprep.subr.mxu1 %v6524_v56  ;;  %6358 = vrcp.f32 %v3984_v20 }
 0x3b9   :  { %5715 = vmatmul.mubr.msk.f32.vlgmr.msra.gmra.mrb[10].mxu1 %vm810_vm2, %v2723_v38  ;;  %v6355_v4 = vpop.eup %6354 }
 0x3ba   :  { %5718 = vmatpush3.msra.mxu1 %v652_v13  ;;  %5719 = vmatprep.mubr.msk.f32.mxu1 %vm6525_vm1, %v6524_v56  ;;  %v4297_v8 = vpop.xlane.xlu0 %4296  ;;  %v3672_v58 = vmul.f32 %v6355_v4, %v7261_v47  ;;  %v656_v47 = vmul.f32 %v6979_v3, %v6882_v40  ;;  %v4563_v13 = vld [vmem:[%s7649_s20 + $0x50] sm:$0xff] }
 0x3bb   :  { %5732 = vmatprep.subr.mxu1 %v6524_v56  ;;  %6360 = vrcp.f32 %v4297_v8 }
 0x3bd   :  { %5720 = vmatmul.mubr.msk.f32.vlgmr.msra.gmra.mrb[12].mxu1 %vm810_vm2, %v2724_v11  ;;  %v6357_v14 = vpop.eup %6356  ;;  %v4564_v11 = vld [vmem:[%s7649_s20 + $0x58] sm:$0xff] }
 0x3be   :  { %5733 = vmatpush3.msra.mxu1 %v641_v19  ;;  %5734 = vmatprep.mubr.msk.f32.mxu1 %vm6525_vm1, %v6524_v56  ;;  %v4300_v30 = vpop.xlane.xlu1 %4299  ;;  %v3987_v60 = vmul.f32 %v6357_v14, %v7266_v57  ;;  %v645_v57 = vmul.f32 %v6998_v9, %v7025_v12  ;;  %v7512_v6 = vpack.c.bf16 %v4564_v11, %v4563_v13  ;;  %v4759_v14 = vld [vmem:[#allocation9 + $0x20] sm:$0xff]  ;;  %v4880_v13 = vld [vmem:[#allocation10 + $0x10] sm:$0xff]  ;;  %v6527_v11 = vmov 0.0|0.0  }
 0x3bf   :  { %5737 = vmatprep.subr.mxu1 %v6524_v56  ;;  %6362 = vrcp.f32 %v4300_v30 }
 0x3c1   :  { %5735 = vmatmul.mubr.msk.f32.vlgmr.msra.gmra.mrb[10].mxu1 %vm810_vm2, %v3039_v45  ;;  %v6359_v36 = vpop.eup %6358 }
 0x3c2   :  { %5738 = vmatpush3.msra.mxu1 %v653_v42  ;;  %5739 = vmatprep.mubr.msk.f32.mxu1 %vm6525_vm1, %v6524_v56  ;;  %v3988_v46 = vmul.f32 %v6359_v36, %v7270_v44  ;;  %v657_v44 = vmul.f32 %v6998_v9, %v6882_v40  ;;  %v4554_v40 = vld [vmem:[%s7649_s20 + $0x8] sm:$0xff]  ;;  %v4555_v9 = vld [vmem:[%s7649_s20 + $0x10] sm:$0xff]  ;;  %v6372_v42 = vld [vmem:[%s7646_s0] sm:$0xff] }
 0x3c3   :  { %5752 = vmatprep.subr.mxu1 %v6524_v56  ;;  %v7458_v1 = vpack.c.bf16 %v4556_v53, %v4555_v9  ;;  %v4764_v36 = vld [vmem:[#allocation9 + $0x48] sm:$0xff]  ;;  %v4771_v9 = vld [vmem:[#allocation9 + $0x80] sm:$0xff] }
 0x3c4   :  { %v6119_v16 = vpack.c.bf16 %v4773_v59, %v4771_v9  ;;  %v4900_v59 = vld [vmem:[#allocation10 + $0xb0] sm:$0xff] }
 0x3c5   :  { %5740 = vmatmul.mubr.msk.f32.vlgmr.msra.gmra.mrb[12].mxu1 %vm810_vm2, %v3040_v7  ;;  %v6361_v33 = vpop.eup %6360  ;;  %v6159_v48 = vpack.c.bf16 %v4901_v29, %v4900_v59 }
 0x3c6   :  { %5753 = vmatpush3.msra.mxu1 %v642_v41  ;;  %5754 = vmatprep.mubr.msk.f32.mxu1 %vm6525_vm1, %v6524_v56  ;;  %v4303_v3 = vmul.f32 %v6361_v33, %v7274_v43  ;;  %v4553_v43 = vld [vmem:[%s7649_s20] sm:$0xff]  ;;  %v4756_v41 = vld [vmem:[#allocation9 + $0x8] sm:$0xff] }
 0x3c7   :  { %5757 = vmatprep.subr.mxu1 %v6524_v56  ;;  %v4763_v33 = vld [vmem:[#allocation9 + $0x40] sm:$0xff] }
 0x3c9   :  { %5755 = vmatmul.mubr.msk.f32.vlgmr.msra.gmra.mrb[10].mxu1 %vm810_vm2, %v3355_v49  ;;  %v6363_v24 = vpop.eup %6362  ;;  %v4758_v49 = vld [vmem:[#allocation9 + $0x18] sm:$0xff] }
 0x3ca   :  { %5758 = vmatpush3.msra.mxu1 %v654_v17  ;;  %5759 = vmatprep.mubr.msk.f32.mxu1 %vm6525_vm1, %v6524_v56  ;;  %v4304_v12 = vmul.f32 %v6363_v24, %v7278_v25  ;;  %v7453_v25 = vpack.c.bf16 %v4554_v40, %v4553_v43  ;;  %v6101_v35 = vpack.c.bf16 %v4758_v49, %v4756_v41  ;;  %v4757_v17 = vld [vmem:[#allocation9 + $0x10] sm:$0xff]  ;;  %v4768_v24 = vld [vmem:[#allocation9 + $0x68] sm:$0xff]  ;;  %v4774_v40 = vld [vmem:[#allocation9 + $0x98] sm:$0xff] }
 0x3cb   :  { %5772 = vmatprep.subr.mxu1 %v6524_v56  ;;  %v4772_v43 = vld [vmem:[#allocation9 + $0x88] sm:$0xff]  ;;  %v4886_v41 = vld [vmem:[#allocation10 + $0x40] sm:$0xff] }
 0x3cc   :  { %6078 = vmatprep.subr.bf16.mxu0 %v7453_v25  ;;  %v6117_v53 = vpack.c.bf16 %v4774_v40, %v4772_v43  ;;  %v4887_v49 = vld [vmem:[#allocation10 + $0x48] sm:$0xff] }
 0x3cd   :  { %5760 = vmatmul.mubr.msk.f32.vlgmr.msra.gmra.mrb[12].mxu1 %vm810_vm2, %v3356_v21  ;;  %v6103_v21 = vpack.c.bf16 %v4757_v17, %v4755_v15  ;;  %v6138_v15 = vpack.c.bf16 %v4887_v49, %v4886_v41  ;;  %v4889_v17 = vld [vmem:[#allocation10 + $0x58] sm:$0xff] }
 0x3ce   :  { %5773 = vmatpush3.msra.mxu1 %v643_v27  ;;  %5774 = vmatprep.mubr.msk.f32.mxu1 %vm6525_vm1, %v6524_v56 }
 0x3cf   :  { %5777 = vmatprep.subr.mxu1 %v6524_v56 }
 0x3d1   :  { %5775 = vmatmul.mubr.msk.f32.vlgmr.msra.gmra.mrb[10].mxu1 %vm810_vm2, %v3671_v54 }
 0x3d2   :  { %5778 = vmatpush3.msra.mxu1 %v655_v22  ;;  %5779 = vmatprep.mubr.msk.f32.mxu1 %vm6525_vm1, %v6524_v56  ;;  %v4760_v22 = vld [vmem:[#allocation9 + $0x28] sm:$0xff] }
 0x3d3   :  { %5792 = vmatprep.subr.mxu1 %v6524_v56 }
 0x3d5   :  { %5780 = vmatmul.mubr.msk.f32.vlgmr.msra.gmra.mrb[12].mxu1 %vm810_vm2, %v3672_v58  ;;  %v4762_v58 = vld [vmem:[#allocation9 + $0x38] sm:$0xff] }
 0x3d6   :  { %5793 = vmatpush3.msra.mxu1 %v644_v31  ;;  %5794 = vmatprep.mubr.msk.f32.mxu1 %vm6525_vm1, %v6524_v56  ;;  %v6105_v30 = vpack.c.bf16 %v4762_v58, %v4760_v22  ;;  %v4761_v31 = vld [vmem:[#allocation9 + $0x30] sm:$0xff]  ;;  %v4893_v22 = vld [vmem:[#allocation10 + $0x78] sm:$0xff] }
 0x3d7   :  { %5797 = vmatprep.subr.mxu1 %v6524_v56 }
 0x3d9   :  { %5795 = vmatmul.mubr.msk.f32.vlgmr.msra.gmra.mrb[10].mxu1 %vm810_vm2, %v3987_v60  ;;  %v6107_v60 = vpack.c.bf16 %v4761_v31, %v4759_v14  ;;  %v4895_v14 = vld [vmem:[#allocation10 + $0x88] sm:$0xff] }
 0x3da   :  { %5798 = vmatpush3.msra.mxu1 %v656_v47  ;;  %5799 = vmatprep.mubr.msk.f32.mxu1 %vm6525_vm1, %v6524_v56  ;;  %v4766_v47 = vld [vmem:[#allocation9 + $0x58] sm:$0xff] }
 0x3db   :  { %5812 = vmatprep.subr.mxu1 %v6524_v56 }
 0x3dd   :  { %5800 = vmatmul.mubr.msk.f32.vlgmr.msra.gmra.mrb[12].mxu1 %vm810_vm2, %v3988_v46  ;;  %v6109_v46 = vpack.c.bf16 %v4766_v47, %v4764_v36  ;;  %v4897_v36 = vld [vmem:[#allocation10 + $0x98] sm:$0xff] }
 0x3de   :  { %5813 = vmatpush3.msra.mxu1 %v645_v57  ;;  %5814 = vmatprep.mubr.msk.f32.mxu1 %vm6525_vm1, %v6524_v56  ;;  %v4765_v57 = vld [vmem:[#allocation9 + $0x50] sm:$0xff] }
 0x3df   :  { %5817 = vmatprep.subr.mxu1 %v6524_v56 }
 0x3e1   :  { %5815 = vmatmul.mubr.msk.f32.vlgmr.msra.gmra.mrb[10].mxu1 %vm810_vm2, %v4303_v3  ;;  %v6111_v3 = vpack.c.bf16 %v4765_v57, %v4763_v33 }
 0x3e2   :  { %5818 = vmatpush3.msra.mxu1 %v657_v44  ;;  %5819 = vmatprep.mubr.msk.f32.mxu1 %vm6525_vm1, %v6524_v56  ;;  %v4770_v44 = vld [vmem:[#allocation9 + $0x78] sm:$0xff] }
 0x3e3   :  { %6054 = vmatprep.subr.bf16.mxu1 %v7453_v25 }
 0x3e5   :  { %5820 = vmatmul.mubr.msk.f32.vlgmr.msra.gmra.mrb[12].mxu1 %vm810_vm2, %v4304_v12  ;;  %v6113_v12 = vpack.c.bf16 %v4770_v44, %v4768_v24 }
 0x3e6   :  { %6056 = vmatpush3.bf16.msra.mxu1 %v7453_v25 }
 0x3e7   :  { %6058 = vmatprep.subr.bf16.mxu1 %v7458_v1 }
 0x3ea   :  { %6060 = vmatpush3.bf16.msra.mxu1 %v7458_v1 }
 0x3eb   :  { %6062 = vmatprep.subr.bf16.mxu1 %v7470_v32 }
 0x3ee   :  { %6064 = vmatpush3.bf16.msra.mxu1 %v7470_v32 }
 0x3ef   :  { %6066 = vmatprep.subr.bf16.mxu1 %v7480_v51 }
 0x3f2   :  { %6068 = vmatpush3.bf16.msra.mxu1 %v7480_v51 }
 0x3f3   :  { %6070 = vmatprep.subr.bf16.mxu1 %v7490_v5 }
 0x3f6   :  { %6072 = vmatpush3.bf16.msra.mxu1 %v7490_v5 }
 0x3f7   :  { %6074 = vmatprep.subr.bf16.mxu1 %v7512_v6 }
 0x3fa   :  { %6076 = vmatpush3.bf16.msra.mxu1 %v7512_v6 }
 0x3fb   :  { %6102 = vmatprep.subr.bf16.mxu1 %v6101_v35  ;;  %v4888_v35 = vld [vmem:[#allocation10 + $0x50] sm:$0xff] }
 0x4b4   :  { %v4374_v23 = vpop.f32.mrb[10].mxu1 }
 0x4b5   :  { %v5816_v38 = vpop.f32.mrb[11].mxu1  ;;  %5846 = vmatprep.mubr.msk.f32.mxu0 %vm168_vm0, %v4374_v23  ;;  %v4777_v23 = vld [vmem:[#allocation9 + $0xb0] sm:$0xff] }
 0x4b6   :  { %v6123_v38 = vpack.c.bf16 %v4777_v23, %v4775_v52 }
 0x4b8   :  { %v4447_v55 = vpop.f32.mrb[12].mxu1 }
 0x4b9   :  { %v5821_v34 = vpop.f32.mrb[13].mxu1  ;;  %5847 = vmatmul.mubr.msk.f32.vlgmr.msra.gmra.mrb[44].mxu0 %vm168_vm0, %v4447_v55  ;;  %v4878_v55 = vld [vmem:[#allocation10] sm:$0xff] }
 0x4ba   :  { %6080 = vmatpush3.bf16.msra.mxu0 %v7453_v25  ;;  %v4879_v34 = vld [vmem:[#allocation10 + $0x8] sm:$0xff] }
 0x4bb   :  { %6082 = vmatprep.subr.bf16.mxu0 %v7458_v1 }
 0x4be   :  { %6084 = vmatpush3.bf16.msra.mxu0 %v7458_v1 }
 0x4bf   :  { %6086 = vmatprep.subr.bf16.mxu0 %v7470_v32 }
 0x4c2   :  { %6088 = vmatpush3.bf16.msra.mxu0 %v7470_v32 }
 0x4c3   :  { %6090 = vmatprep.subr.bf16.mxu0 %v7480_v51 }
 0x4c6   :  { %6092 = vmatpush3.bf16.msra.mxu0 %v7480_v51 }
 0x4c7   :  { %6094 = vmatprep.subr.bf16.mxu0 %v7490_v5 }
 0x4ca   :  { %6096 = vmatpush3.bf16.msra.mxu0 %v7490_v5 }
 0x4cb   :  { %6098 = vmatprep.subr.bf16.mxu0 %v7512_v6 }
 0x4ce   :  { %6100 = vmatpush3.bf16.msra.mxu0 %v7512_v6 }
 0x4cf   :  { %6125 = vmatprep.subr.bf16.mxu0 %v6527_v11 }
 0x58c   :  { %v5848_v19 = vpop.f32.mrb[44].mxu0 }
 0x58d   :  { %v4550_v45 = vadd.f32 %v5848_v19, %v5273_v28  ;;  %v4544_v26 = vpop.f32.mrb[45].mxu0  ;;  %v4881_v19 = vld [vmem:[#allocation10 + $0x18] sm:$0xff] }
 0x58e   :  { %v4545_v10 = vadd.f32 %v5273_v28, %v4544_v26  ;;  %v6126_v28 = vpack.c.bf16 %v4879_v34, %v4878_v55  ;;  %v4882_v26 = vld [vmem:[#allocation10 + $0x20] sm:$0xff] }
 0x58f   :  { %v4566_v62 = vadd.f32 %v6373_v18, %v4550_v45  ;;  %v6129_v45 = vpack.c.bf16 %v4881_v19, %v4880_v13  ;;  %v4885_v18 = vld [vmem:[#allocation10 + $0x38] sm:$0xff] }
 0x590   :  { %v4565_v7 = vadd.f32 %v6372_v42, %v4545_v10  ;;  %v4883_v10 = vld [vmem:[#allocation10 + $0x28] sm:$0xff] }
 0x591   :  { %v6132_v42 = vpack.c.bf16 %v4883_v10, %v4882_v26 }
 0x592   :  { %5873 = vmatprep.mubr.msk.f32.mxu1 %vm168_vm0, %v4565_v7 }
 0x593   :  { %5874 = vmatmul.mubr.msk.f32.vlgmr.msra.gmra.mrb[14].mxu1 %vm168_vm0, %v4566_v62 }
 0x594   :  { %4861 = vmatprep.mubr.f32.mxu1 %v6524_v56  ;;  %6104 = vmatpush1.bf16.msra.mxu1 %v6103_v21  ;;  %v6141_v21 = vpack.c.bf16 %v4889_v17, %v4888_v35 }
 0x595   :  { %6106 = vmatprep.subr.bf16.mxu1 %v6105_v30  ;;  %v4894_v30 = vld [vmem:[#allocation10 + $0x80] sm:$0xff] }
 0x596   :  { %v6150_v31 = vpack.c.bf16 %v4895_v14, %v4894_v30  ;;  %v5292_v14 = vld [vmem:[%s7632_s19] ss:$0 sm:$0xff] }
 0x598   :  { %6108 = vmatpush1.bf16.msra.mxu1 %v6107_v60  ;;  %v4896_v60 = vld [vmem:[#allocation10 + $0x90] sm:$0xff] }
 0x599   :  { %6110 = vmatprep.subr.bf16.mxu1 %v6109_v46  ;;  %v6153_v47 = vpack.c.bf16 %v4897_v36, %v4896_v60 }
 0x59c   :  { %6112 = vmatpush1.bf16.msra.mxu1 %v6111_v3 }
 0x59d   :  { %6114 = vmatprep.subr.bf16.mxu1 %v6113_v12  ;;  %v5280_v12 = vld [vmem:[%s7625_s12] ss:$0 sm:$0xff] }
 0x5a0   :  { %6116 = vmatpush1.bf16.msra.mxu1 %v6115_v39  ;;  %v5281_v39 = vld [vmem:[%s7626_s13] ss:$0 sm:$0xff] }
 0x5a1   :  { %6118 = vmatprep.subr.bf16.mxu1 %v6117_v53 }
 0x5a4   :  { %6120 = vmatpush1.bf16.msra.mxu1 %v6119_v16  ;;  %v4779_v16 = vld [vmem:[%s7628_s15] sm:$0x3] }
 0x5a5   :  { %6122 = vmatprep.subr.bf16.mxu1 %v6121_v63  ;;  %v4787_v63 = vsub.s32 1, %v6752_v61  ;;  %v4784_v52 = vrot.slane %v4779_v16, %v6763_v2  ;;  %v5284_v61 = vld [vmem:[%s7630_s17] ss:$0 sm:$0xff] }
 0x5a7   :  { %v4788_v23 = vrot.slane %v4779_v16, %v4787_v63 }
 0x5a8   :  { %6124 = vmatpush1.bf16.msra.mxu1 %v6123_v38 }
 0x5a9   :  { %6162 = vmatprep.subr.bf16.mxu1 %v7453_v25 }
 0x666   :  { %v5875_v20 = vpop.f32.mrb[14].mxu1 }
 0x667   :  { %v7530_v50 = vsub.f32 %v4566_v62, %v5875_v20  ;;  %v4641_v27 = vpop.f32.mrb[15].mxu1  ;;  %v4890_v20 = vld [vmem:[#allocation10 + $0x60] sm:$0xff] }
 0x668   :  { %v7532_v54 = vsub.f32 %v4565_v7, %v4641_v27  ;;  %v4884_v7 = vld [vmem:[#allocation10 + $0x30] sm:$0xff]  ;;  %v4891_v27 = vld [vmem:[#allocation10 + $0x68] sm:$0xff] }
 0x669   :  { %v4653_v4 = vmul.f32 %v7530_v50, %v7530_v50  ;;  %v6135_v62 = vpack.c.bf16 %v4885_v18, %v4884_v7 }
 0x66a   :  { %v4652_v8 = vmul.f32 %v7532_v54, %v7532_v54 }
 0x66c   :  { %5900 = vmatprep.mubr.msk.f32.mxu0 %vm168_vm0, %v4652_v8  ;;  %v6144_v8 = vpack.c.bf16 %v4891_v27, %v4890_v20 }
 0x66d   :  { %5901 = vmatmul.mubr.msk.f32.vlgmr.msra.gmra.mrb[46].mxu0 %vm168_vm0, %v4653_v4  ;;  %v4892_v4 = vld [vmem:[#allocation10 + $0x70] sm:$0xff] }
 0x66e   :  { %6127 = vmatpush1.bf16.msra.mxu0 %v6126_v28  ;;  %v6147_v58 = vpack.c.bf16 %v4893_v22, %v4892_v4 }
 0x66f   :  { %6128 = vmatprep.subr.bf16.mxu0 %v6527_v11 }
 0x672   :  { %6130 = vmatpush1.bf16.msra.mxu0 %v6129_v45 }
 0x673   :  { %6131 = vmatprep.subr.bf16.mxu0 %v6527_v11 }
 0x676   :  { %6133 = vmatpush1.bf16.msra.mxu0 %v6132_v42 }
 0x677   :  { %6134 = vmatprep.subr.bf16.mxu0 %v6527_v11 }
 0x67a   :  { %6136 = vmatpush1.bf16.msra.mxu0 %v6135_v62 }
 0x67b   :  { %6137 = vmatprep.subr.bf16.mxu0 %v6527_v11 }
 0x67e   :  { %6139 = vmatpush1.bf16.msra.mxu0 %v6138_v15 }
 0x67f   :  { %6140 = vmatprep.subr.bf16.mxu0 %v6527_v11 }
 0x682   :  { %6142 = vmatpush1.bf16.msra.mxu0 %v6141_v21 }
 0x683   :  { %6143 = vmatprep.subr.bf16.mxu0 %v6527_v11 }
 0x686   :  { %6145 = vmatpush1.bf16.msra.mxu0 %v6144_v8 }
 0x687   :  { %6146 = vmatprep.subr.bf16.mxu0 %v6527_v11 }
 0x68a   :  { %6148 = vmatpush1.bf16.msra.mxu0 %v6147_v58 }
 0x68b   :  { %6149 = vmatprep.subr.bf16.mxu0 %v6527_v11 }
 0x68e   :  { %6151 = vmatpush1.bf16.msra.mxu0 %v6150_v31 }
 0x68f   :  { %6152 = vmatprep.subr.bf16.mxu0 %v6527_v11 }
 0x692   :  { %6154 = vmatpush1.bf16.msra.mxu0 %v6153_v47 }
 0x693   :  { %6155 = vmatprep.subr.bf16.mxu0 %v6527_v11 }
 0x740   :  { %v5902_v46 = vpop.f32.mrb[46].mxu0 }
 0x741   :  { %v4732_v33 = vadd.f32 1e-05, %v5902_v46  ;;  %v4726_v57 = vpop.f32.mrb[47].mxu0 }
 0x742   :  { %v4727_v3 = vadd.f32 1e-05, %v4726_v57 }
 0x743   :  { %6364 = vrsqrt.f32 %v4732_v33 }
 0x744   :  { %6366 = vrsqrt.f32 %v4727_v3 }
 0x74d   :  { %v6365_v24 = vpop.eup %6364 }
 0x74e   :  { %v6367_v44 = vpop.eup %6366  ;;  %v4738_v0 = vmul.f32 %v6365_v24, %v7530_v50  ;;  %v4899_v50 = vld [vmem:[#allocation10 + $0xa8] sm:$0xff] }
 0x74f   :  { %v4737_v37 = vmul.f32 %v6367_v44, %v7532_v54 }
 0x750   :  { %v4746_v9 = vmul.f32 %v5280_v12, %v4738_v0 }
 0x751   :  { %v4745_v43 = vmul.f32 %v5280_v12, %v4737_v37 }
 0x752   :  { %v4754_v53 = vadd.f32 %v5281_v39, %v4746_v9 }
 0x753   :  { %v4753_v40 = vadd.f32 %v5281_v39, %v4745_v43 }
 0x755   :  { %5282 = vmatmul.mubr.msk.f32.vlgmr.msra.gmra.mrb[16].mxu1 %vm168_vm0, %v4753_v40 }
 0x756   :  { %4867 = vmatprep.mubr.f32.mxu1 %v6524_v56  ;;  %6164 = vmatpush3.bf16.msra.mxu1 %v7453_v25  ;;  %v4898_v56 = vld [vmem:[#allocation10 + $0xa0] sm:$0xff] }
 0x757   :  { %6166 = vmatprep.subr.bf16.mxu1 %v7458_v1  ;;  %v6156_v54 = vpack.c.bf16 %v4899_v50, %v4898_v56 }
 0x759   :  { %5283 = vmatmul.mubr.msk.f32.gmra.mrb[18].mxu1 %vm168_vm0, %v4754_v53  ;;  %6157 = vmatpush1.bf16.msra.mxu0 %v6156_v54 }
 0x75a   :  { %6168 = vmatpush3.bf16.msra.mxu1 %v7458_v1  ;;  %6158 = vmatprep.subr.bf16.mxu0 %v6527_v11 }
 0x75b   :  { %6170 = vmatprep.subr.bf16.mxu1 %v7470_v32 }
 0x75d   :  { %6160 = vmatpush1.bf16.msra.mxu0 %v6159_v48 }
 0x75e   :  { %6172 = vmatpush3.bf16.msra.mxu1 %v7470_v32 }
 0x75f   :  { %6174 = vmatprep.subr.bf16.mxu1 %v7480_v51 }
 0x762   :  { %6176 = vmatpush3.bf16.msra.mxu1 %v7480_v51 }
 0x763   :  { %6178 = vmatprep.subr.bf16.mxu1 %v7490_v5 }
 0x766   :  { %6180 = vmatpush3.bf16.msra.mxu1 %v7490_v5 }
 0x767   :  { %6182 = vmatprep.subr.bf16.mxu1 %v7512_v6 }
 0x76a   :  { %6184 = vmatpush3.bf16.msra.mxu1 %v7512_v6 }
 0x76b   :  { %6186 = vmatprep.subr.bf16.mxu1 %v7453_v25 }
 0x828   :  { %v4863_v38 = vpop.f32.mrb[16].mxu1 }
 0x829   :  { %v4864_v55 = vadd.f32 %v4863_v38, %v4784_v52  ;;  %v4865_v34 = vpop.f32.mrb[17].mxu1 }
 0x82a   :  { %v4866_v13 = vadd.f32 %v4865_v34, %v4788_v23 }
 0x82b   :  { %v4874_v19 = vmax.f32 %v4864_v55, 0.0 }
 0x82c   :  { %v4875_v28 = vmax.f32 %v4866_v13, 0.0  ;;  %v4869_v11 = vpop.f32.mrb[18].mxu1 }
 0x82d   :  { %v4870_v45 = vadd.f32 %v4869_v11, %v4784_v52  ;;  %v4871_v26 = vpop.f32.mrb[19].mxu1 }
 0x82e   :  { %v4872_v10 = vadd.f32 %v4871_v26, %v4788_v23  ;;  %5285 = vmatprep.mubr.msk.f32.mxu0 %vm4909_vm3, %v4875_v28 }
 0x82f   :  { %4981 = vmatmul.mubr.f32.vlgmr.msra.gmra.mrb[48].mxu0 %v4874_v19  ;;  %v4876_v7 = vmax.f32 %v4870_v45, 0.0 }
 0x830   :  { %v4877_v42 = vmax.f32 %v4872_v10, 0.0 }
 0x832   :  { %5286 = vmatprep.mubr.msk.f32.mxu0 %vm4909_vm3, %v4877_v42 }
 0x833   :  { %4986 = vmatmul.mubr.f32.gmra.mrb[50].mxu0 %v4876_v7 }
 0x902   :  { %v4982_v2 = vpop.f32.mrb[48].mxu0 }
 0x903   :  { %v4983_v18 = vadd.f32 %v5284_v61, %v4982_v2  ;;  %v4984_v62 = vpop.f32.mrb[49].mxu0 }
 0x905   :  { %v4991_v41 = vadd.f32 %v4983_v18, %v4753_v40 }
 0x906   :  { %v4987_v49 = vpop.f32.mrb[50].mxu0 }
 0x907   :  { %v4988_v15 = vadd.f32 %v5284_v61, %v4987_v49  ;;  %v4989_v35 = vpop.f32.mrb[51].mxu0  ;;  %5927 = vmatprep.mubr.msk.f32.mxu1 %vm168_vm0, %v4991_v41 }
 0x909   :  { %v4992_v17 = vadd.f32 %v4988_v15, %v4754_v53 }
 0x90b   :  { %5928 = vmatmul.mubr.msk.f32.vlgmr.msra.gmra.mrb[20].mxu1 %vm168_vm0, %v4992_v17 }
 0x90c   :  { %6188 = vmatpush3.bf16.msra.mxu1 %v7453_v25 }
 0x90d   :  { %6190 = vmatprep.subr.bf16.mxu1 %v7458_v1 }
 0x910   :  { %6192 = vmatpush3.bf16.msra.mxu1 %v7458_v1 }
 0x911   :  { %6194 = vmatprep.subr.bf16.mxu1 %v7470_v32 }
 0x914   :  { %6196 = vmatpush3.bf16.msra.mxu1 %v7470_v32 }
 0x915   :  { %6198 = vmatprep.subr.bf16.mxu1 %v7480_v51 }
 0x918   :  { %6200 = vmatpush3.bf16.msra.mxu1 %v7480_v51 }
 0x919   :  { %6202 = vmatprep.subr.bf16.mxu1 %v7490_v5 }
 0x91c   :  { %6204 = vmatpush3.bf16.msra.mxu1 %v7490_v5 }
 0x91d   :  { %6206 = vmatprep.subr.bf16.mxu1 %v7512_v6 }
 0x920   :  { %6208 = vmatpush3.bf16.msra.mxu1 %v7512_v6  ;;  %v5291_v6 = vld [vmem:[%s7631_s18] ss:$0 sm:$0xff] }
 0x9de   :  { %v5929_v25 = vpop.f32.mrb[20].mxu1 }
 0x9df   :  { %v5077_v21 = vsub.f32 %v4992_v17, %v5929_v25  ;;  %v5067_v20 = vpop.f32.mrb[21].mxu1 }
 0x9e0   :  { %v5076_v1 = vsub.f32 %v4991_v41, %v5067_v20 }
 0x9e1   :  { %v5079_v8 = vmul.f32 %v5077_v21, %v5077_v21 }
 0x9e2   :  { %v5078_v27 = vmul.f32 %v5076_v1, %v5076_v1 }
 0x9e4   :  { %5954 = vmatprep.mubr.msk.f32.mxu1 %vm168_vm0, %v5078_v27 }
 0x9e5   :  { %5955 = vmatmul.mubr.msk.f32.vlgmr.msra.gmra.mrb[22].mxu1 %vm168_vm0, %v5079_v8 }
 0xab8   :  { %v5956_v32 = vpop.f32.mrb[22].mxu1 }
 0xab9   :  { %v5158_v51 = vadd.f32 1e-05, %v5956_v32  ;;  %v5152_v4 = vpop.f32.mrb[23].mxu1 }
 0xaba   :  { %v5153_v22 = vadd.f32 1e-05, %v5152_v4 }
 0xabb   :  { %6368 = vrsqrt.f32 %v5158_v51 }
 0xabc   :  { %6370 = vrsqrt.f32 %v5153_v22 }
 0xac5   :  { %v6369_v5 = vpop.eup %6368 }
 0xac6   :  { %v6371_v58 = vpop.eup %6370  ;;  %v5164_v30 = vmul.f32 %v6369_v5, %v5077_v21 }
 0xac7   :  { %v5163_v31 = vmul.f32 %v6371_v58, %v5076_v1 }
 0xac8   :  { %v5172_v60 = vmul.f32 %v5291_v6, %v5164_v30 }
 0xac9   :  { %v5171_v36 = vmul.f32 %v5291_v6, %v5163_v31 }
 0xaca   :  { %v5180_v47 = vadd.f32 %v5292_v14, %v5172_v60 }
 0xacb   :  { %v5179_v46 = vadd.f32 %v5292_v14, %v5171_v36 }
 0xacc   :  { %5182 = vst.msk [vmem:[%s7650_s5 + $0x8] sm:$0xff] %vm168_vm0, %v5180_v47 }
 0xacd   :  { %5181 = vst.msk [vmem:[%s7650_s5] sm:$0xff] %vm168_vm0, %v5179_v46 }
 0xace   :  { %5187 = vsyncpa [#allocation3], 1 }
 0xacf   :  { %5188 = vsyncpa [#allocation5], 1 }
 0xad0   :  { %5189 = vsyncpa [#allocation8], 1 }
 0xad1   :  { %5190 = vsyncpa [#allocation11], 1 }

</bundles_post_ra>
